<compile_context>
chip_gen: v5e
topology: v5e:2x2
jax: 0.10.0
libtpu: 0.0.40
codegen_flags: <defaults>
</compile_context>

<pallas_src>
import functools

import jax
import jax.numpy as jnp
from jax import lax
from jax.experimental import pallas as pl
from jax.experimental.pallas import tpu as pltpu

_MIB = 1024 * 1024


# --------------------------------------------------------------------------
# Hardware / sizing helpers
# --------------------------------------------------------------------------
def _physical_vmem_bytes():
    """Physical VMEM of the current TPU (64 MiB v7x, 128 MiB v5e/v6e)."""
    try:
        return int(pltpu.get_tpu_info().vmem_capacity_bytes)
    except Exception:
        return 64 * _MIB  # conservative fallback (v7x per-TensorCore)


def _fast_footprint(c_pad, n, out_itemsize):
    """Estimated VMEM bytes of the single-block fast path."""
    f32 = 4
    ins = 2 * 2 * c_pad * n * f32                 # V, T full blocks, double-buffered
    out = 2 * 2 * c_pad * n * out_itemsize        # (2C, N) output, double-buffered
    temps = 6 * n * n * f32 + 2 * c_pad * n * f32  # score/prob temporaries + attended
    return ins + out + temps


def _flash_footprint(c_pad, bq, bk, kv_buffers, out_itemsize):
    """Estimated VMEM bytes of one flash-path grid step (incl. hidden temps)."""
    f32 = 4
    q_in = 2 * 2 * c_pad * bq * f32               # V,T query tiles, double-buffered
    kv_in = 2 * kv_buffers * c_pad * bk * f32     # V,T kv tiles
    out = 2 * 2 * c_pad * bq * out_itemsize       # (2C, bq) output, double-buffered
    scratch = 2 * c_pad * bq * f32 + 4 * bq * f32  # acc_v/acc_t + m/l
    temps = 4 * bk * bq * f32                     # s_v, s_t and both prob tiles
    return q_in + kv_in + out + scratch + temps


def _select_flash_blocks(n, c_pad, batch, phys_vmem, out_itemsize, kv_buffers,
                         block_q=None, block_k=None):
    """Pick (bq, bk) under an explicit VMEM budget.

    Priorities (lexicographic):
      1. B*nq >= 2           -> both v7x TensorCores / megacore halves busy
      2. bq, bk >= 256       -> fill the 256x256 MXUs of v6e/v7x
      3. B*nq >= 4           -> extra parallel slack
      4. larger bq           -> fewer kv re-streams (kv HBM read = B*nq*N*C*8 B)
      5. larger bk           -> fewer grid steps (~0.35 us each)
    """
    cands = [c for c in (512, 256, 128) if n % c == 0] or [n]
    if block_q is not None:
        assert n % block_q == 0, "block_q must divide H*W"
    if block_k is not None:
        assert n % block_k == 0, "block_k must divide H*W"
    bq_cands = [block_q] if block_q is not None else cands
    bk_cands = [block_k] if block_k is not None else cands

    budget = int(0.7 * phys_vmem)  # leave headroom for Mosaic internal scratch
    fitting = [(bq, bk) for bq in bq_cands for bk in bk_cands
               if _flash_footprint(c_pad, bq, bk, kv_buffers, out_itemsize) <= budget]
    if not fitting:
        return bq_cands[-1], bk_cands[-1]  # smallest available tiles

    def score(pair):
        bq, bk = pair
        cells = batch * (n // bq)
        return (min(cells, 2), min(bq, 256) + min(bk, 256), min(cells, 4), bq, bk)

    return max(fitting, key=score)


# --------------------------------------------------------------------------
# Kernels
# --------------------------------------------------------------------------
def _mutual_attention_small_kernel(v_ref, t_ref, out_ref):
    """Single-block path: full N and C per grid step, plain softmax, all f32."""
    C = v_ref.shape[1]
    v = v_ref[0]  # (C, N)
    t = t_ref[0]  # (C, N)

    dn = (((0,), (0,)), ((), ()))  # contract channel axis of both operands
    # s_v[m, n] = sum_c T[c, m] V[c, n]  (attn_V logits, keys on sublanes)
    s_v = lax.dot_general(t, v, dn, preferred_element_type=jnp.float32)
    # s_t[m, n] = sum_c V[c, m] T[c, n]  (attn_T logits)
    s_t = lax.dot_general(v, t, dn, preferred_element_type=jnp.float32)

    def _softmax_over_keys(s):  # softmax over the key axis (axis 0)
        m = jnp.max(s, axis=0, keepdims=True)
        p = jnp.exp(s - m)
        return p / jnp.sum(p, axis=0, keepdims=True)

    p_v = _softmax_over_keys(s_v)
    p_t = _softmax_over_keys(s_t)
    v_att = jnp.dot(t, p_v, preferred_element_type=jnp.float32)  # (C, N)
    t_att = jnp.dot(v, p_t, preferred_element_type=jnp.float32)  # (C, N)

    # Fused channel concat: V half into rows [0:C], T half into [C:2C].
    out_ref[0, 0:C, :] = (v + v_att).astype(out_ref.dtype)
    out_ref[0, C:2 * C, :] = (t + t_att).astype(out_ref.dtype)


def _mutual_attention_flash_kernel(v_q_ref, t_q_ref, v_kv_ref, t_kv_ref, out_ref,
                                   m_v, l_v, acc_v, m_t, l_t, acc_t,
                                   *, matmul_bf16):
    """Flash (online-softmax) path; kv axis = grid axis 2 (reduction)."""
    C = v_q_ref.shape[1]
    ki = pl.program_id(2)
    nk = pl.num_programs(2)

    @pl.when(ki == 0)
    def _init():
        m_v[...] = jnp.full_like(m_v, -jnp.inf)
        l_v[...] = jnp.zeros_like(l_v)
        acc_v[...] = jnp.zeros_like(acc_v)
        m_t[...] = jnp.full_like(m_t, -jnp.inf)
        l_t[...] = jnp.zeros_like(l_t)
        acc_t[...] = jnp.zeros_like(acc_t)

    v_q = v_q_ref[0]   # (C, bq)
    t_q = t_q_ref[0]   # (C, bq)
    v_k = v_kv_ref[0]  # (C, bk)
    t_k = t_kv_ref[0]  # (C, bk)

    mdt = jnp.bfloat16 if matmul_bf16 else jnp.float32
    dn = (((0,), (0,)), ((), ()))  # contract channel axis of both operands
    # s_v[m, n] = sum_c T[c, m] V[c, n]  (attn_V logits, keys on sublanes)
    s_v = lax.dot_general(t_k.astype(mdt), v_q.astype(mdt), dn,
                          preferred_element_type=jnp.float32)
    # s_t[m, n] = sum_c V[c, m] T[c, n]  (attn_T logits)
    # NOTE: s_t == s_v^T only holds untiled; the transposed block lives at
    # grid cell (ki, qi), so both tiles are computed (tk*tq*C MACs each).
    s_t = lax.dot_general(v_k.astype(mdt), t_q.astype(mdt), dn,
                          preferred_element_type=jnp.float32)

    def _online_update(s, vals, m_ref, l_ref, acc_ref):
        # s: (bk, bq) scores; vals: (C, bk) values for this attention direction.
        m_new = jnp.maximum(m_ref[...], jnp.max(s, axis=0, keepdims=True))  # (1, bq)
        alpha = jnp.exp(m_ref[...] - m_new)                                 # (1, bq)
        p = jnp.exp(s - m_new)                                              # (bk, bq)
        l_ref[...] = alpha * l_ref[...] + jnp.sum(p, axis=0, keepdims=True)
        acc_ref[...] = alpha * acc_ref[...] + jnp.dot(
            vals.astype(mdt), p.astype(mdt),
            preferred_element_type=jnp.float32)                             # (C, bq)
        m_ref[...] = m_new

    _online_update(s_v, t_k, m_v, l_v, acc_v)   # V_att aggregates T values
    _online_update(s_t, v_k, m_t, l_t, acc_t)   # T_att aggregates V values

    @pl.when(ki == nk - 1)
    def _finalize():
        # Exact reciprocal: runs once per query tile, approx saved nothing.
        out_ref[0, 0:C, :] = (v_q + acc_v[...] / l_v[...]).astype(out_ref.dtype)
        out_ref[0, C:2 * C, :] = (t_q + acc_t[...] / l_t[...]).astype(out_ref.dtype)


# --------------------------------------------------------------------------
# Wrapper
# --------------------------------------------------------------------------
def mutual_attention_fusion(V, T, params=None, *, block_q=None, block_k=None,
                            use_flash=None, kv_buffers=2, out_dtype=jnp.float32):
    """V, T: (B, C, H, W) float32 -> fused (B, 2C, H, W) of out_dtype."""
    B, C, H, W = V.shape
    N = H * W
    C_pad = ((C + 7) // 8) * 8  # sublane-align channels (full-width stores)
    out_itemsize = jnp.dtype(out_dtype).itemsize
    phys_vmem = _physical_vmem_bytes()

    v_flat = V.reshape(B, C, N).astype(jnp.float32)
    t_flat = T.reshape(B, C, N).astype(jnp.float32)
    if C_pad != C:
        pad = ((0, 0), (0, C_pad - C), (0, 0))
        v_flat = jnp.pad(v_flat, pad)
        t_flat = jnp.pad(t_flat, pad)

    if use_flash is None:
        use_flash = _fast_footprint(C_pad, N, out_itemsize) > min(8 * _MIB,
                                                                  phys_vmem // 4)

    if not use_flash:
        footprint = _fast_footprint(C_pad, N, out_itemsize)
        vmem_limit = int(min(0.95 * phys_vmem, max(1.5 * footprint, 32 * _MIB)))
        fused = pl.pallas_call(
            _mutual_attention_small_kernel,
            out_shape=jax.ShapeDtypeStruct((B, 2 * C_pad, N), out_dtype),
            grid_spec=pltpu.PrefetchScalarGridSpec(
                num_scalar_prefetch=0,
                grid=(B,),
                in_specs=[
                    pl.BlockSpec((1, C_pad, N), lambda b: (b, 0, 0)),
                    pl.BlockSpec((1, C_pad, N), lambda b: (b, 0, 0)),
                ],
                out_specs=pl.BlockSpec((1, 2 * C_pad, N), lambda b: (b, 0, 0)),
            ),
            compiler_params=pltpu.CompilerParams(
                dimension_semantics=("parallel",),
                vmem_limit_bytes=vmem_limit,
            ),
        )(v_flat, t_flat)
    else:
        bq, bk = _select_flash_blocks(N, C_pad, B, phys_vmem, out_itemsize,
                                      kv_buffers, block_q, block_k)
        nq, nkv = N // bq, N // bk
        footprint = _flash_footprint(C_pad, bq, bk, kv_buffers, out_itemsize)
        vmem_limit = int(min(0.95 * phys_vmem, max(1.5 * footprint, 32 * _MIB)))

        kernel = functools.partial(_mutual_attention_flash_kernel,
                                   matmul_bf16=(C_pad >= 128))
        # kv_buffers=3 can help on v5e (hides kv re-stream latency); only pass
        # pipeline_mode when it deviates from the default of 2.
        kv_kwargs = {} if kv_buffers == 2 else {"pipeline_mode": pl.Buffered(kv_buffers)}

        fused = pl.pallas_call(
            kernel,
            out_shape=jax.ShapeDtypeStruct((B, 2 * C_pad, N), out_dtype),
            grid_spec=pltpu.PrefetchScalarGridSpec(
                num_scalar_prefetch=0,
                grid=(B, nq, nkv),
                in_specs=[
                    pl.BlockSpec((1, C_pad, bq), lambda b, qi, ki: (b, 0, qi)),  # V queries / residual
                    pl.BlockSpec((1, C_pad, bq), lambda b, qi, ki: (b, 0, qi)),  # T queries / residual
                    pl.BlockSpec((1, C_pad, bk), lambda b, qi, ki: (b, 0, ki), **kv_kwargs),  # V kv
                    pl.BlockSpec((1, C_pad, bk), lambda b, qi, ki: (b, 0, ki), **kv_kwargs),  # T kv
                ],
                out_specs=pl.BlockSpec((1, 2 * C_pad, bq),
                                       lambda b, qi, ki: (b, 0, qi)),
                scratch_shapes=[
                    pltpu.VMEM((1, bq), jnp.float32),      # m_v
                    pltpu.VMEM((1, bq), jnp.float32),      # l_v
                    pltpu.VMEM((C_pad, bq), jnp.float32),  # acc_v
                    pltpu.VMEM((1, bq), jnp.float32),      # m_t
                    pltpu.VMEM((1, bq), jnp.float32),      # l_t
                    pltpu.VMEM((C_pad, bq), jnp.float32),  # acc_t
                ],
            ),
            compiler_params=pltpu.CompilerParams(
                dimension_semantics=("parallel", "parallel", "arbitrary"),
                vmem_limit_bytes=vmem_limit,
            ),
        )(v_flat, t_flat, v_flat, t_flat)

    if C_pad != C:
        fused = jnp.concatenate([fused[:, :C], fused[:, C_pad:C_pad + C]], axis=1)
    return fused.reshape(B, 2 * C, H, W).astype(out_dtype)


# --------------------------------------------------------------------------
# Parity helpers
# --------------------------------------------------------------------------
def init_params(channels, key):
    """Deterministic init of the conv params the PyTorch forward never uses."""
    ks = jax.random.split(key, 4)
    c = channels
    return {
        "proj_q_w": jax.random.normal(ks[0], (c, c, 1, 1), jnp.float32) * 0.02,
        "proj_q_b": jnp.zeros((c,), jnp.float32),
        "proj_k_w": jax.random.normal(ks[1], (c, c, 1, 1), jnp.float32) * 0.02,
        "proj_k_b": jnp.zeros((c,), jnp.float32),
        "proj_v_w": jax.random.normal(ks[2], (c, c, 1, 1), jnp.float32) * 0.02,
        "proj_v_b": jnp.zeros((c,), jnp.float32),
        "output_proj_w": jax.random.normal(ks[3], (c, 2 * c, 1, 1), jnp.float32) * 0.02,
        "output_proj_b": jnp.zeros((c,), jnp.float32),
    }


def _reference(V, T):
    """Pure-JAX f32 reference of the PyTorch forward."""
    B, C, H, W = V.shape
    N = H * W
    vf = V.reshape(B, C, N)
    tf = T.reshape(B, C, N)
    attn_V = jax.nn.softmax(jnp.einsum("bcn,bcm->bnm", vf, tf), axis=-1)
    attn_T = jax.nn.softmax(jnp.einsum("bcn,bcm->bnm", tf, vf), axis=-1)
    V_att = jnp.einsum("bcm,bnm->bcn", tf, attn_V).reshape(B, C, H, W)
    T_att = jnp.einsum("bcm,bnm->bcn", vf, attn_T).reshape(B, C, H, W)
    return jnp.concatenate([V + V_att, T + T_att], axis=1)


if __name__ == "__main__":
    key = jax.random.PRNGKey(0)
    k_v, k_t, k_p = jax.random.split(key, 3)

    B, C, H, W = 2, 4, 16, 16          # N = 256
    V = jax.random.normal(k_v, (B, C, H, W), jnp.float32)
    T = jax.random.normal(k_t, (B, C, H, W), jnp.float32)

    params = init_params(C, k_p)       # declared-but-unused in forward (parity only)
    ref = _reference(V, T)

    # 1) Auto dispatch -> small-shape fast path (one full-extent block per batch).
    out_fast = mutual_attention_fusion(V, T, params)
    out_fast = jax.block_until_ready(out_fast)
    assert out_fast.shape == (B, 2 * C, H, W)
    assert jnp.allclose(out_fast, ref, atol=1e-4, rtol=1e-4), "fast path mismatch"

    # 2) Forced flash path (2 query tiles x 2 kv tiles) to exercise the tiled
    #    online-softmax machinery; all-f32 matmuls here since C < 128.
    out_flash = mutual_attention_fusion(V, T, params, use_flash=True,
                                        block_q=128, block_k=128)
    out_flash = jax.block_until_ready(out_flash)
    assert out_flash.shape == (B, 2 * C, H, W)
    assert jnp.allclose(out_flash, ref, atol=1e-4, rtol=1e-4), "flash path mismatch"

    print("KERNEL_OK")
</pallas_src>

<mosaic_0001>
module attributes {stable_mosaic.version = 11 : i64} {
  func.func @_mutual_attention_small_kernel(%arg0: i32, %arg1: memref<1x8x256xf32, #tpu.memory_space<vmem>>, %arg2: memref<1x8x256xf32, #tpu.memory_space<vmem>>, %arg3: memref<1x16x256xf32, #tpu.memory_space<vmem>>) attributes {dimension_semantics = [#tpu.dimension_semantics<parallel>], iteration_bounds = array<i64: 2>, scalar_prefetch = 0 : i64, scratch_operands = 0 : i64, tpu.core_type = #tpu.core_type<tc>, window_params = [{transform_indices = @transform_0, window_bounds = array<i64: 1, 8, 256>}, {transform_indices = @transform_1, window_bounds = array<i64: 1, 8, 256>}, {transform_indices = @transform_2, window_bounds = array<i64: 1, 16, 256>}]} {
    %c0 = arith.constant 0 : index
    %c0_0 = arith.constant 0 : index
    %c0_1 = arith.constant 0 : index
    %0 = vector.load %arg1[%c0, %c0_0, %c0_1] : memref<1x8x256xf32, #tpu.memory_space<vmem>>, vector<1x8x256xf32>
    %1 = vector.shape_cast %0 : vector<1x8x256xf32> to vector<8x256xf32>
    %c0_2 = arith.constant 0 : index
    %c0_3 = arith.constant 0 : index
    %c0_4 = arith.constant 0 : index
    %2 = vector.load %arg2[%c0_2, %c0_3, %c0_4] : memref<1x8x256xf32, #tpu.memory_space<vmem>>, vector<1x8x256xf32>
    %3 = vector.shape_cast %2 : vector<1x8x256xf32> to vector<8x256xf32>
    %cst = arith.constant dense<0.000000e+00> : vector<256x256xf32>
    %4 = tpu.matmul %3, %1, %cst {dimension_numbers = #tpu.dot_dimension_numbers<[0], [0], [1], [1], [0, 1, 1, 1], [], []>} : vector<8x256xf32>, vector<8x256xf32>, vector<256x256xf32> -> vector<256x256xf32>
    %cst_5 = arith.constant dense<0.000000e+00> : vector<256x256xf32>
    %5 = tpu.matmul %1, %3, %cst_5 {dimension_numbers = #tpu.dot_dimension_numbers<[0], [0], [1], [1], [0, 1, 1, 1], [], []>} : vector<8x256xf32>, vector<8x256xf32>, vector<256x256xf32> -> vector<256x256xf32>
    %cst_6 = arith.constant dense<0xFF800000> : vector<256xf32>
    %6 = vector.multi_reduction <maximumf>, %4, %cst_6 [0] : vector<256x256xf32> to vector<256xf32>
    %7 = vector.shape_cast %6 : vector<256xf32> to vector<1x256xf32>
    %8 = vector.broadcast %7 : vector<1x256xf32> to vector<256x256xf32>
    %9 = arith.subf %4, %8 : vector<256x256xf32>
    %10 = math.exp %9 : vector<256x256xf32>
    %cst_7 = arith.constant dense<0.000000e+00> : vector<256xf32>
    %11 = vector.multi_reduction <add>, %10, %cst_7 [0] : vector<256x256xf32> to vector<256xf32>
    %12 = vector.shape_cast %11 : vector<256xf32> to vector<1x256xf32>
    %13 = vector.broadcast %12 : vector<1x256xf32> to vector<256x256xf32>
    %14 = arith.divf %10, %13 : vector<256x256xf32>
    %cst_8 = arith.constant dense<0xFF800000> : vector<256xf32>
    %15 = vector.multi_reduction <maximumf>, %5, %cst_8 [0] : vector<256x256xf32> to vector<256xf32>
    %16 = vector.shape_cast %15 : vector<256xf32> to vector<1x256xf32>
    %17 = vector.broadcast %16 : vector<1x256xf32> to vector<256x256xf32>
    %18 = arith.subf %5, %17 : vector<256x256xf32>
    %19 = math.exp %18 : vector<256x256xf32>
    %cst_9 = arith.constant dense<0.000000e+00> : vector<256xf32>
    %20 = vector.multi_reduction <add>, %19, %cst_9 [0] : vector<256x256xf32> to vector<256xf32>
    %21 = vector.shape_cast %20 : vector<256xf32> to vector<1x256xf32>
    %22 = vector.broadcast %21 : vector<1x256xf32> to vector<256x256xf32>
    %23 = arith.divf %19, %22 : vector<256x256xf32>
    %cst_10 = arith.constant dense<0.000000e+00> : vector<8x256xf32>
    %24 = tpu.matmul %3, %14, %cst_10 {dimension_numbers = #tpu.dot_dimension_numbers<[1], [0], [0], [1], [0, 0, 1, 1], [], []>} : vector<8x256xf32>, vector<256x256xf32>, vector<8x256xf32> -> vector<8x256xf32>
    %cst_11 = arith.constant dense<0.000000e+00> : vector<8x256xf32>
    %25 = tpu.matmul %1, %23, %cst_11 {dimension_numbers = #tpu.dot_dimension_numbers<[1], [0], [0], [1], [0, 0, 1, 1], [], []>} : vector<8x256xf32>, vector<256x256xf32>, vector<8x256xf32> -> vector<8x256xf32>
    %26 = arith.addf %1, %24 : vector<8x256xf32>
    %c0_12 = arith.constant 0 : index
    %c0_13 = arith.constant 0 : index
    %c0_14 = arith.constant 0 : index
    %27 = vector.load %arg3[%c0_12, %c0_13, %c0_14] : memref<1x16x256xf32, #tpu.memory_space<vmem>>, vector<1x8x256xf32>
    %28 = vector.shape_cast %27 : vector<1x8x256xf32> to vector<8x256xf32>
    %29 = vector.shape_cast %26 : vector<8x256xf32> to vector<1x8x256xf32>
    tpu.vector_store %arg3[%c0_12, %c0_13, %c0_14], %29 {strides = array<i32>} : memref<1x16x256xf32, #tpu.memory_space<vmem>>, vector<1x8x256xf32>,
    %30 = arith.addf %3, %25 : vector<8x256xf32>
    %c0_15 = arith.constant 0 : index
    %c8 = arith.constant 8 : index
    %c0_16 = arith.constant 0 : index
    %31 = vector.load %arg3[%c0_15, %c8, %c0_16] : memref<1x16x256xf32, #tpu.memory_space<vmem>>, vector<1x8x256xf32>
    %32 = vector.shape_cast %31 : vector<1x8x256xf32> to vector<8x256xf32>
    %33 = vector.shape_cast %30 : vector<8x256xf32> to vector<1x8x256xf32>
    tpu.vector_store %arg3[%c0_15, %c8, %c0_16], %33 {strides = array<i32>} : memref<1x16x256xf32, #tpu.memory_space<vmem>>, vector<1x8x256xf32>,
    return
  }
  func.func @transform_0(%arg0: i32) -> (i32, i32, i32) {
    %c0_i32 = arith.constant 0 : i32
    %c0_i32_0 = arith.constant 0 : i32
    %c0_i32_1 = arith.constant 0 : i32
    return %arg0, %c0_i32, %c0_i32_0 : i32, i32, i32
  }
  func.func @transform_1(%arg0: i32) -> (i32, i32, i32) {
    %c0_i32 = arith.constant 0 : i32
    %c0_i32_0 = arith.constant 0 : i32
    %c0_i32_1 = arith.constant 0 : i32
    return %arg0, %c0_i32, %c0_i32_0 : i32, i32, i32
  }
  func.func @transform_2(%arg0: i32) -> (i32, i32, i32) {
    %c0_i32 = arith.constant 0 : i32
    %c0_i32_0 = arith.constant 0 : i32
    %c0_i32_1 = arith.constant 0 : i32
    return %arg0, %c0_i32, %c0_i32_0 : i32, i32, i32
  }
}

</mosaic_0001>

<bundles_post_ra>
// kernel: tpu_custom_call.1
= control target key start
LH: loop header
LB: loop body
LE: loop exit
PB: predicated region body
PF: predicated region fallthrough
CT: control target
= control target key end

     0   :  { %7 = vsyncpa [#allocation3], 0  ;;  %s4387_s0 = inlined_call_operand.hbm [shape: f32[2,8,256], index: 0, kind: input, shape index: {}]   ;;  %s4388_s1 = inlined_call_operand.hbm [shape: f32[2,8,256], index: 1, kind: input, shape index: {}]   ;;  %s4389_s2 = inlined_call_operand.hbm [shape: f32[2,16,256], index: 2, kind: output, shape index: {}]  }
   0x1   :  { %9 = vsyncpa [#allocation3 + $0x1], 0 }
   0x2   :  { %10 = vsyncpa [#allocation6], 0 }
   0x3   :  { %12 = vsyncpa [#allocation6 + $0x1], 0 }
   0x4   :  { %13 = vsyncpa [#allocation4], 0 }
   0x5   :  { %15 = vsyncpa [#allocation4 + $0x1], 0  ;;  %s2743_s9 = smov 0   ;;  %s2745_s10 = smov 0  }
   0x6   :  { %s2747_s11 = smov 0   ;;  %s2749_s12 = smov 0  }
   0x7 LB: > { %s2764_s13 = sadd.s32 4294967295, %s2724_s12   ;;  %s2123_s14 = sadd.s32 4294967294, %s2724_s12   ;;  %s2724_s12 = sphi %s2749_s12, %s4748_s12   ;;  %s2720_s11 = sphi %s2747_s11, %s4747_s11   ;;  %s2716_s10 = sphi %s2745_s10, %s4746_s10   ;;  %s2712_s9 = sphi %s2743_s9, %s4745_s9  }
   0x8   : > { %s2768_s15 = sadd.s32 1, %s2724_s12   ;;  %s28_s16 = sadd.s32 1, %s2720_s11 }
   0x9   : > { %s25_s17 = ssub.s32 %s2724_s12, %s2768_s15  ;;  %p35_p0 = scmp.ne.s32.totalorder %s2720_s11, %s2716_s10 }
   0xa   : > { %p26_p1 = scmp.eq.s32.totalorder %s25_s17, 0  ;;  %p36_p2 = scmp.eq.s32.totalorder %s2724_s12, 0 }
   0xb   : > { %p41_p3 = scmp.ne.s32.totalorder %s2716_s10, %s2712_s9  ;;  %p42_p4 = scmp.eq.s32.totalorder %s2764_s13, 0 }
   0xc   : > { %s2780_s18 = scalar_select %p26_p1, %s2720_s11, %s28_s16  }
   0xd   : > { %p2782_p5 = por %p36_p2, %p35_p0  ;;  %p2786_p6 = por %p42_p4, %p41_p3 }
   0xe   : > { %p91_p7 = scmp.eq.s32.totalorder %s2764_s13, 1  ;;  %p97_p8 = scmp.eq.s32.totalorder %s2123_s14, 1 }
   0xf   : > { %p2289_p10 = scmp.lt.s32.totalorder %s2724_s12, 2  ;;  %s2802_s23 = sand.u32 1, %s2720_s11  }
  0x10   : > { %p2793_p11 = por %p91_p7, %p35_p0  ;;  %p2797_p12 = por %p97_p8, %p41_p3 }
  0x11   : > { %s2269_s24 = sshll.u32 %s2724_s12, 4  ;;  %s2126_s25 = sshll.u32 %s2802_s23, 4 }
  0x12   : > { %s126_s28 = scalar_lea.hbm %s4387_s0, %s2269_s24  ;;  %s121_s30 = scalar_lea.vmem [#allocation2], %s2126_s25 }
  0x13   : > { %s128_s29 = sshll.u32 %s126_s28, 4  ;;  %s130_s3 = sshll.u32 %s121_s30, 4  ;;  %s129_s29 = int_to_ptr.hbm [resolvable:$true] %s128_s29  ;;  %s131_s3 = int_to_ptr.vmem [resolvable:$true] %s130_s3 }
  0x14   : > { %p2811_p13 = pnand %p2289_p10, %p2782_p5  ;;  %p2132_p0 = scmp.ge.s32.totalorder %s2724_s12, 1 }
  0x15   : > { %p155_p1 = scmp.lt.s32.totalorder %s2724_s12, 3  ;;  %s118_s5 = scalar_lea.sflag [#allocation3], %s2802_s23 }
  0x16   : > { %s2594_s6 = sshra.s32 %s129_s29, 4  ;;  %p2598_p3 = pneg %p2811_p13  ;;  %s2595_s6 = int_to_ptr.hbm [resolvable:$true] %s2594_s6 }
  0x17   : > { %s2596_s7 = scalar_lea.hbm %s2595_s6, 16  ;;  %s2601_s16 = scalar_lea.hbm %s4387_s0, 32 }
  0x18   : > { %p2597_p2 = scmp.ne.s32.totalorder %s2595_s6, %s2596_s7  ;;  %p2602_p5 = scmp.lt.s32.totalorder %s2595_s6, %s4387_s0 }
  0x19   : > { %p2603_p8 = scmp.lt.s32.totalorder %s2601_s16, %s2596_s7 }
  0x1a   : > { %p2599_p4 = pnand %p2598_p3, %p2597_p2 }
  0x1b   : > { %p2604_p10 = por %p2603_p8, %p2602_p5 }
  0x1c   : > { %p2600_p7 = pneg %p2599_p4 }
  0x1e   : > { %p2605_p9 = pnand %p2604_p10, %p2600_p7 }
  0x20   : > { %2608 = shalt.err (!%p2605_p9)
}
  0x21   : > { %2281 = dma.hbm_to_vmem [thread:$0]  (!%p2811_p13), %s129_s29, 256, %s131_s3, %s118_s5  }
  0x22   : > { %p2835_p2 = pnand %p2132_p0, %p155_p1  ;;  %s146_s30 = scalar_lea.hbm %s4388_s1, %s2269_s24 }
  0x23   : > { %s148_s6 = sshll.u32 %s146_s30, 4  ;;  %s141_s7 = scalar_lea.vmem [#allocation5], %s2126_s25  ;;  %s149_s6 = int_to_ptr.hbm [resolvable:$true] %s148_s6 }
  0x24   : > { %s150_s8 = sshll.u32 %s141_s7, 4  ;;  %s138_s14 = scalar_lea.sflag [#allocation6], %s2802_s23  ;;  %s151_s8 = int_to_ptr.vmem [resolvable:$true] %s150_s8 }
  0x25   : > { %s2624_s16 = sshra.s32 %s149_s6, 4  ;;  %s2631_s5 = scalar_lea.hbm %s4388_s1, 32  ;;  %s2625_s16 = int_to_ptr.hbm [resolvable:$true] %s2624_s16 }
  0x26   : > { %s2626_s17 = scalar_lea.hbm %s2625_s16, 16  ;;  %p2632_p4 = scmp.lt.s32.totalorder %s2625_s16, %s4388_s1 }
  0x27   : > { %p2627_p9 = scmp.ne.s32.totalorder %s2625_s16, %s2626_s17  ;;  %p2633_p7 = scmp.lt.s32.totalorder %s2631_s5, %s2626_s17 }
  0x29   : > { %p2629_p0 = pnand %p2627_p9, %p2598_p3  ;;  %p2634_p5 = por %p2633_p7, %p2632_p4 }
  0x2b   : > { %p2630_p1 = pneg %p2629_p0 }
  0x2d   : > { %p2635_p8 = pnand %p2634_p5, %p2630_p1 }
  0x2f   : > { %2638 = shalt.err (!%p2635_p8)
}
  0x30   : > { %2284 = dma.hbm_to_vmem [thread:$0]  (!%p2811_p13), %s149_s6, 256, %s151_s8, %s138_s14  }
  0x31   : > { %159 = sbr.rel (%p2835_p2) target bundleno = 1087 (0x43f), region = 28 }
  0x36   : > { %s2857_s23 = sand.u32 1, %s2716_s10  }
  0x37   : > { %s2133_s25 = sshll.u32 %s2857_s23, 4  ;;  %s162_s27 = scalar_lea.sflag [#allocation3], %s2857_s23 }
  0x38   : > { %s2861_s28 = scalar_lea.vmem [#allocation2], %s2133_s25 }
  0x39   : > { %2699 = dma.done.wait (%p2786_p6), %s162_s27, 256  }
  0x3a   : > { %2701 = vsyncadd (%p2786_p6), %s162_s27, 4294967040  ;;  %s172_s4 = scalar_lea.sflag [#allocation6], %s2857_s23  ;;  %s2868_s26 = scalar_lea.vmem [#allocation5], %s2133_s25 }
  0x3b   : > { %2703 = dma.done.wait (%p2786_p6), %s172_s4, 256  }
  0x3c   : > { %2705 = vsyncadd (%p2786_p6), %s172_s4, 4294967040  ;;  %v204_v0 = vld [vmem:[%s2868_s26] sm:$0xff]  ;;  %v205_v1 = vld [vmem:[%s2868_s26 + $0x8] sm:$0xff]  ;;  %vm270_vm0 = vcmask 64512   ;;  %s2135_s20 = sshll.u32 %s2857_s23, 5  ;;  %s2271_s6 = sshll.u32 %s2764_s13, 5 }
  0x3d   : > { %206 = vxpose.xlu0.b32.start.end [1/1] (short) %v204_v0, 128  ;;  %238 = vxpose.xlu1.b32.start.end [1/1] (short) %v205_v1, 128  ;;  %v202_v2 = vld [vmem:[%s2861_s28] sm:$0xff]  ;;  %v203_v3 = vld [vmem:[%s2861_s28 + $0x8] sm:$0xff]  ;;  %s201_s30 = scalar_lea.vmem [#allocation7], %s2135_s20  ;;  %s2023_s14 = scalar_lea.hbm %s4389_s2, %s2271_s6 }
  0x3e   : > { %382 = vmatpush.msra.mxu0 %v202_v2  ;;  %768 = vmatpush.msra.mxu2 %v204_v0  ;;  %s2024_s16 = sshll.u32 %s201_s30, 4  ;;  %s2026_s17 = sshll.u32 %s2023_s14, 4  ;;  %s2025_s16 = int_to_ptr.vmem [resolvable:$true] %s2024_s16  ;;  %s2027_s17 = int_to_ptr.hbm [resolvable:$true] %s2026_s17 }
  0x3f   : > { %881 = vmatpush.msra.mxu3 %v205_v1  ;;  %495 = vmatpush.msra.mxu1 %v203_v3  ;;  %s2012_s29 = scalar_lea.sflag [#allocation4], %s2857_s23  ;;  %s2668_s3 = sshra.s32 %s2027_s17, 4  ;;  %s2669_s3 = int_to_ptr.hbm [resolvable:$true] %s2668_s3 }
  0x40   : > { %s2670_s5 = scalar_lea.hbm %s2669_s3, 32  ;;  %s2674_s24 = scalar_lea.hbm %s4389_s2, 64 }
  0x41   : > { %p2671_p6 = scmp.ne.s32.totalorder %s2669_s3, %s2670_s5  ;;  %p2675_p10 = scmp.lt.s32.totalorder %s2669_s3, %s4389_s2 }
  0x42   : > { %p2676_p2 = scmp.lt.s32.totalorder %s2674_s24, %s2670_s5 }
  0x43   : > { %p2672_p13 = pnand %p2671_p6, %p2793_p11 }
  0x44   : > { %p2677_p9 = por %p2676_p2, %p2675_p10 }
  0x45   : > { %p2673_p3 = pneg %p2672_p13 }
  0x47   : > { %p2678_p0 = pnand %p2677_p9, %p2673_p3 }
  0xbd   : > { %593 = vxpose.xlu0.b32.start.end [1/1] (short) %v202_v2, 128  ;;  %625 = vxpose.xlu1.b32.start.end [1/1] (short) %v203_v3, 128 }
  0xe1   : > { %v222_v4 = vpop.trf.xlu0  ;;  %v254_v16 = vpop.trf.xlu1 }
  0xe2   : > { %2136 = vmatmul.msk.f32.vlgmr.msra.gmra.mxu0 %vm270_vm0, %v222_v4  ;;  %2168 = vmatmul.msk.f32.vlgmr.msra.gmra.mxu1 %vm270_vm0, %v222_v4 }
  0xe9   : > { %v223_v5 = vpop.trf.xlu0  ;;  %v255_v18 = vpop.trf.xlu1 }
  0xea   : > { %2137 = vmatmul.msk.f32.gmra.mxu0 %vm270_vm0, %v223_v5  ;;  %2169 = vmatmul.msk.f32.gmra.mxu1 %vm270_vm0, %v223_v5 }
  0xf1   : > { %v224_v6 = vpop.trf.xlu0  ;;  %v256_v20 = vpop.trf.xlu1 }
  0xf2   : > { %2138 = vmatmul.msk.f32.gmra.mxu0 %vm270_vm0, %v224_v6  ;;  %2170 = vmatmul.msk.f32.gmra.mxu1 %vm270_vm0, %v224_v6 }
  0xf9   : > { %v225_v7 = vpop.trf.xlu0  ;;  %v257_v22 = vpop.trf.xlu1 }
  0xfa   : > { %2139 = vmatmul.msk.f32.gmra.mxu0 %vm270_vm0, %v225_v7  ;;  %2171 = vmatmul.msk.f32.gmra.mxu1 %vm270_vm0, %v225_v7 }
 0x101   : > { %v226_v8 = vpop.trf.xlu0  ;;  %v258_v26 = vpop.trf.xlu1 }
 0x102   : > { %2140 = vmatmul.msk.f32.gmra.mxu0 %vm270_vm0, %v226_v8  ;;  %2172 = vmatmul.msk.f32.gmra.mxu1 %vm270_vm0, %v226_v8 }
 0x109   : > { %v227_v9 = vpop.trf.xlu0  ;;  %v259_v30 = vpop.trf.xlu1 }
 0x10a   : > { %2141 = vmatmul.msk.f32.gmra.mxu0 %vm270_vm0, %v227_v9  ;;  %2173 = vmatmul.msk.f32.gmra.mxu1 %vm270_vm0, %v227_v9 }
 0x111   : > { %v228_v10 = vpop.trf.xlu0  ;;  %v260_v34 = vpop.trf.xlu1 }
 0x112   : > { %2142 = vmatmul.msk.f32.gmra.mxu0 %vm270_vm0, %v228_v10  ;;  %2174 = vmatmul.msk.f32.gmra.mxu1 %vm270_vm0, %v228_v10 }
 0x119   : > { %v229_v11 = vpop.trf.xlu0  ;;  %v261_v38 = vpop.trf.xlu1 }
 0x11a   : > { %2143 = vmatmul.msk.f32.gmra.mxu0 %vm270_vm0, %v229_v11  ;;  %2175 = vmatmul.msk.f32.gmra.mxu1 %vm270_vm0, %v229_v11 }
 0x121   : > { %v230_v12 = vpop.trf.xlu0  ;;  %v262_v42 = vpop.trf.xlu1 }
 0x122   : > { %2144 = vmatmul.msk.f32.gmra.mxu0 %vm270_vm0, %v230_v12  ;;  %2176 = vmatmul.msk.f32.gmra.mxu1 %vm270_vm0, %v230_v12 }
 0x129   : > { %v231_v13 = vpop.trf.xlu0  ;;  %v263_v46 = vpop.trf.xlu1 }
 0x12a   : > { %2145 = vmatmul.msk.f32.gmra.mxu0 %vm270_vm0, %v231_v13  ;;  %2177 = vmatmul.msk.f32.gmra.mxu1 %vm270_vm0, %v231_v13 }
 0x131   : > { %v232_v14 = vpop.trf.xlu0  ;;  %v264_v50 = vpop.trf.xlu1 }
 0x132   : > { %2146 = vmatmul.msk.f32.gmra.mxu0 %vm270_vm0, %v232_v14  ;;  %2178 = vmatmul.msk.f32.gmra.mxu1 %vm270_vm0, %v232_v14 }
 0x139   : > { %v233_v15 = vpop.trf.xlu0  ;;  %v265_v54 = vpop.trf.xlu1 }
 0x13a   : > { %2147 = vmatmul.msk.f32.gmra.mxu0 %vm270_vm0, %v233_v15  ;;  %2179 = vmatmul.msk.f32.gmra.mxu1 %vm270_vm0, %v233_v15 }
 0x141   : > { %v234_v17 = vpop.trf.xlu0  ;;  %v266_v58 = vpop.trf.xlu1 }
 0x142   : > { %2148 = vmatmul.msk.f32.gmra.mxu0 %vm270_vm0, %v234_v17  ;;  %2180 = vmatmul.msk.f32.gmra.mxu1 %vm270_vm0, %v234_v17 }
 0x149   : > { %v235_v19 = vpop.trf.xlu0  ;;  %v267_v62 = vpop.trf.xlu1 }
 0x14a   : > { %2149 = vmatmul.msk.f32.gmra.mxu0 %vm270_vm0, %v235_v19  ;;  %2181 = vmatmul.msk.f32.gmra.mxu1 %vm270_vm0, %v235_v19 }
 0x151   : > { %v236_v21 = vpop.trf.xlu0  ;;  %v268_v2 = vpop.trf.xlu1 }
 0x152   : > { %2150 = vmatmul.msk.f32.gmra.mxu0 %vm270_vm0, %v236_v21  ;;  %2182 = vmatmul.msk.f32.gmra.mxu1 %vm270_vm0, %v236_v21 }
 0x159   : > { %v237_v23 = vpop.trf.xlu0  ;;  %v269_v6 = vpop.trf.xlu1 }
 0x15a   : > { %2151 = vmatmul.msk.f32.gmra.mxu0 %vm270_vm0, %v237_v23  ;;  %2183 = vmatmul.msk.f32.gmra.mxu1 %vm270_vm0, %v237_v23 }
 0x15f   : > { %v2910_v24 = vpop.f32.mrf.mxu0  ;;  %v2912_v25 = vpop.f32.mrf.mxu1 }
 0x161   : > { %v609_v27 = vpop.trf.xlu0  ;;  %v641_v11 = vpop.trf.xlu1 }
 0x162   : > { %2152 = vmatmul.msk.f32.gmra.mxu0 %vm270_vm0, %v254_v16  ;;  %2184 = vmatmul.msk.f32.gmra.mxu1 %vm270_vm0, %v254_v16 }
 0x163   : > { %2200 = vmatmul.msk.f32.vlgmr.msra.gmra.mxu2 %vm270_vm0, %v609_v27  ;;  %2232 = vmatmul.msk.f32.vlgmr.msra.gmra.mxu3 %vm270_vm0, %v609_v27 }
 0x167   : > { %v2918_v28 = vpop.f32.mrf.mxu0  ;;  %v2920_v29 = vpop.f32.mrf.mxu1 }
 0x169   : > { %v610_v31 = vpop.trf.xlu0  ;;  %v642_v15 = vpop.trf.xlu1 }
 0x16a   : > { %2153 = vmatmul.msk.f32.gmra.mxu0 %vm270_vm0, %v255_v18  ;;  %2185 = vmatmul.msk.f32.gmra.mxu1 %vm270_vm0, %v255_v18 }
 0x16b   : > { %2201 = vmatmul.msk.f32.gmra.mxu2 %vm270_vm0, %v610_v31  ;;  %2233 = vmatmul.msk.f32.gmra.mxu3 %vm270_vm0, %v610_v31 }
 0x16f   : > { %v2926_v32 = vpop.f32.mrf.mxu0  ;;  %v2928_v33 = vpop.f32.mrf.mxu1 }
 0x170   : > { %4505 = vst [vmem:[#allocation11_spill] sm:$0xff] %v2926_v32 }
 0x171   : > { %v611_v35 = vpop.trf.xlu0  ;;  %v643_v19 = vpop.trf.xlu1 }
 0x172   : > { %2154 = vmatmul.msk.f32.gmra.mxu0 %vm270_vm0, %v256_v20  ;;  %2186 = vmatmul.msk.f32.gmra.mxu1 %vm270_vm0, %v256_v20 }
 0x173   : > { %2202 = vmatmul.msk.f32.gmra.mxu2 %vm270_vm0, %v611_v35  ;;  %2234 = vmatmul.msk.f32.gmra.mxu3 %vm270_vm0, %v611_v35 }
 0x177   : > { %v2934_v36 = vpop.f32.mrf.mxu0  ;;  %v2936_v37 = vpop.f32.mrf.mxu1 }
 0x178   : > { %4506 = vst [vmem:[#allocation12_spill] sm:$0xff] %v2934_v36 }
 0x179   : > { %4507 = vst [vmem:[#allocation13_spill] sm:$0xff] %v2936_v37  ;;  %v612_v39 = vpop.trf.xlu0  ;;  %v644_v27 = vpop.trf.xlu1 }
 0x17a   : > { %2155 = vmatmul.msk.f32.gmra.mxu0 %vm270_vm0, %v257_v22  ;;  %2187 = vmatmul.msk.f32.gmra.mxu1 %vm270_vm0, %v257_v22 }
 0x17b   : > { %2203 = vmatmul.msk.f32.gmra.mxu2 %vm270_vm0, %v612_v39  ;;  %2235 = vmatmul.msk.f32.gmra.mxu3 %vm270_vm0, %v612_v39 }
 0x17f   : > { %v2942_v40 = vpop.f32.mrf.mxu0  ;;  %v2944_v41 = vpop.f32.mrf.mxu1 }
 0x181   : > { %v613_v43 = vpop.trf.xlu0 }
 0x182   : > { %2156 = vmatmul.msk.f32.gmra.mxu0 %vm270_vm0, %v258_v26  ;;  %2188 = vmatmul.msk.f32.gmra.mxu1 %vm270_vm0, %v258_v26 }
 0x183   : > { %2204 = vmatmul.msk.f32.gmra.mxu2 %vm270_vm0, %v613_v43  ;;  %2236 = vmatmul.msk.f32.gmra.mxu3 %vm270_vm0, %v613_v43 }
 0x187   : > { %v2950_v44 = vpop.f32.mrf.mxu0  ;;  %v2952_v45 = vpop.f32.mrf.mxu1 }
 0x188   : > { %4508 = vst [vmem:[#allocation14_spill] sm:$0xff] %v2950_v44 }
 0x189   : > { %v614_v47 = vpop.trf.xlu0 }
 0x18a   : > { %2157 = vmatmul.msk.f32.gmra.mxu0 %vm270_vm0, %v259_v30  ;;  %2189 = vmatmul.msk.f32.gmra.mxu1 %vm270_vm0, %v259_v30 }
 0x18b   : > { %2205 = vmatmul.msk.f32.gmra.mxu2 %vm270_vm0, %v614_v47  ;;  %2237 = vmatmul.msk.f32.gmra.mxu3 %vm270_vm0, %v614_v47 }
 0x18f   : > { %v2958_v48 = vpop.f32.mrf.mxu0  ;;  %v2960_v49 = vpop.f32.mrf.mxu1 }
 0x191   : > { %v615_v51 = vpop.trf.xlu0 }
 0x192   : > { %2158 = vmatmul.msk.f32.gmra.mxu0 %vm270_vm0, %v260_v34  ;;  %2190 = vmatmul.msk.f32.gmra.mxu1 %vm270_vm0, %v260_v34  ;;  %v645_v34 = vpop.trf.xlu1 }
 0x193   : > { %2206 = vmatmul.msk.f32.gmra.mxu2 %vm270_vm0, %v615_v51  ;;  %2238 = vmatmul.msk.f32.gmra.mxu3 %vm270_vm0, %v615_v51 }
 0x197   : > { %v2966_v52 = vpop.f32.mrf.mxu0  ;;  %v2968_v53 = vpop.f32.mrf.mxu1 }
 0x199   : > { %v616_v55 = vpop.trf.xlu0 }
 0x19a   : > { %2159 = vmatmul.msk.f32.gmra.mxu0 %vm270_vm0, %v261_v38  ;;  %2191 = vmatmul.msk.f32.gmra.mxu1 %vm270_vm0, %v261_v38  ;;  %v646_v43 = vpop.trf.xlu1 }
 0x19b   : > { %2207 = vmatmul.msk.f32.gmra.mxu2 %vm270_vm0, %v616_v55  ;;  %2239 = vmatmul.msk.f32.gmra.mxu3 %vm270_vm0, %v616_v55 }
 0x19f   : > { %v2974_v56 = vpop.f32.mrf.mxu0  ;;  %v2976_v57 = vpop.f32.mrf.mxu1 }
 0x1a1   : > { %v617_v59 = vpop.trf.xlu0 }
 0x1a2   : > { %2160 = vmatmul.msk.f32.gmra.mxu0 %vm270_vm0, %v262_v42  ;;  %2192 = vmatmul.msk.f32.gmra.mxu1 %vm270_vm0, %v262_v42 }
 0x1a3   : > { %2208 = vmatmul.msk.f32.gmra.mxu2 %vm270_vm0, %v617_v59  ;;  %2240 = vmatmul.msk.f32.gmra.mxu3 %vm270_vm0, %v617_v59 }
 0x1a7   : > { %v2982_v60 = vpop.f32.mrf.mxu0  ;;  %v2984_v61 = vpop.f32.mrf.mxu1 }
 0x1a8   : > { %4509 = vst [vmem:[#allocation15_spill] sm:$0xff] %v2982_v60 }
 0x1a9   : > { %v618_v63 = vpop.trf.xlu0 }
 0x1aa   : > { %2161 = vmatmul.msk.f32.gmra.mxu0 %vm270_vm0, %v263_v46  ;;  %2193 = vmatmul.msk.f32.gmra.mxu1 %vm270_vm0, %v263_v46 }
 0x1ab   : > { %2209 = vmatmul.msk.f32.gmra.mxu2 %vm270_vm0, %v618_v63  ;;  %2241 = vmatmul.msk.f32.gmra.mxu3 %vm270_vm0, %v618_v63 }
 0x1af   : > { %v2990_v0 = vpop.f32.mrf.mxu0  ;;  %v2992_v1 = vpop.f32.mrf.mxu1 }
 0x1b1   : > { %v619_v3 = vpop.trf.xlu0 }
 0x1b2   : > { %2162 = vmatmul.msk.f32.gmra.mxu0 %vm270_vm0, %v264_v50  ;;  %2194 = vmatmul.msk.f32.gmra.mxu1 %vm270_vm0, %v264_v50 }
 0x1b3   : > { %2210 = vmatmul.msk.f32.gmra.mxu2 %vm270_vm0, %v619_v3  ;;  %2242 = vmatmul.msk.f32.gmra.mxu3 %vm270_vm0, %v619_v3 }
 0x1b7   : > { %v2998_v4 = vpop.f32.mrf.mxu0  ;;  %v3000_v5 = vpop.f32.mrf.mxu1 }
 0x1b8   : > { %4510 = vst [vmem:[#allocation16_spill] sm:$0xff] %v3000_v5 }
 0x1b9   : > { %v620_v7 = vpop.trf.xlu0 }
 0x1ba   : > { %2163 = vmatmul.msk.f32.gmra.mxu0 %vm270_vm0, %v265_v54  ;;  %2195 = vmatmul.msk.f32.gmra.mxu1 %vm270_vm0, %v265_v54  ;;  %v647_v54 = vpop.trf.xlu1 }
 0x1bb   : > { %2211 = vmatmul.msk.f32.gmra.mxu2 %vm270_vm0, %v620_v7  ;;  %2243 = vmatmul.msk.f32.gmra.mxu3 %vm270_vm0, %v620_v7 }
 0x1bf   : > { %v3006_v8 = vpop.f32.mrf.mxu0  ;;  %v3008_v9 = vpop.f32.mrf.mxu1 }
 0x1c1   : > { %v621_v10 = vpop.trf.xlu0 }
 0x1c2   : > { %2164 = vmatmul.msk.f32.gmra.mxu0 %vm270_vm0, %v266_v58  ;;  %2196 = vmatmul.msk.f32.gmra.mxu1 %vm270_vm0, %v266_v58  ;;  %v648_v3 = vpop.trf.xlu1 }
 0x1c3   : > { %2212 = vmatmul.msk.f32.gmra.mxu2 %vm270_vm0, %v621_v10  ;;  %2244 = vmatmul.msk.f32.gmra.mxu3 %vm270_vm0, %v621_v10 }
 0x1c7   : > { %v3014_v12 = vpop.f32.mrf.mxu0  ;;  %v3016_v13 = vpop.f32.mrf.mxu1 }
 0x1c9   : > { %v622_v14 = vpop.trf.xlu0 }
 0x1ca   : > { %2165 = vmatmul.msk.f32.gmra.mxu0 %vm270_vm0, %v267_v62  ;;  %2197 = vmatmul.msk.f32.gmra.mxu1 %vm270_vm0, %v267_v62 }
 0x1cb   : > { %2213 = vmatmul.msk.f32.gmra.mxu2 %vm270_vm0, %v622_v14  ;;  %2245 = vmatmul.msk.f32.gmra.mxu3 %vm270_vm0, %v622_v14  ;;  %v649_v14 = vpop.trf.xlu1 }
 0x1cf   : > { %v3022_v16 = vpop.f32.mrf.mxu0  ;;  %v3024_v17 = vpop.f32.mrf.mxu1 }
 0x1d1   : > { %v623_v18 = vpop.trf.xlu0 }
 0x1d2   : > { %2166 = vmatmul.msk.f32.gmra.mxu0 %vm270_vm0, %v268_v2  ;;  %2198 = vmatmul.msk.f32.gmra.mxu1 %vm270_vm0, %v268_v2 }
 0x1d3   : > { %2214 = vmatmul.msk.f32.gmra.mxu2 %vm270_vm0, %v623_v18  ;;  %2246 = vmatmul.msk.f32.gmra.mxu3 %vm270_vm0, %v623_v18 }
 0x1d7   : > { %v3030_v20 = vpop.f32.mrf.mxu0  ;;  %v3032_v21 = vpop.f32.mrf.mxu1 }
 0x1d9   : > { %v624_v22 = vpop.trf.xlu0 }
 0x1da   : > { %2167 = vmatmul.msk.f32.gmra.mxu0 %vm270_vm0, %v269_v6  ;;  %2199 = vmatmul.msk.f32.gmra.mxu1 %vm270_vm0, %v269_v6 }
 0x1db   : > { %2215 = vmatmul.msk.f32.gmra.mxu2 %vm270_vm0, %v624_v22  ;;  %2247 = vmatmul.msk.f32.gmra.mxu3 %vm270_vm0, %v624_v22 }
 0x1df   : > { %v3038_v23 = vpop.f32.mrf.mxu0  ;;  %v3040_v26 = vpop.f32.mrf.mxu1 }
 0x1e3   : > { %2216 = vmatmul.msk.f32.gmra.mxu2 %vm270_vm0, %v641_v11  ;;  %2248 = vmatmul.msk.f32.gmra.mxu3 %vm270_vm0, %v641_v11 }
 0x1e6   : > { %v3050_v35 = vpop.f32.mrf.mxu2  ;;  %v3052_v38 = vpop.f32.mrf.mxu3 }
 0x1e7   : > { %v3044_v30 = vpop.f32.mrf.mxu0  ;;  %v3046_v31 = vpop.f32.mrf.mxu1  ;;  %4513 = vst [vmem:[#allocation19_spill] sm:$0xff] %v3050_v35 }
 0x1e8   : > { %4511 = vst [vmem:[#allocation17_spill] sm:$0xff] %v3044_v30 }
 0x1e9   : > { %4512 = vst [vmem:[#allocation18_spill] sm:$0xff] %v3046_v31 }
 0x1ea   : > { %4514 = vst [vmem:[#allocation20_spill] sm:$0xff] %v3052_v38 }
 0x1eb   : > { %2217 = vmatmul.msk.f32.gmra.mxu2 %vm270_vm0, %v642_v15  ;;  %2249 = vmatmul.msk.f32.gmra.mxu3 %vm270_vm0, %v642_v15 }
 0x1ee   : > { %v3060_v46 = vpop.f32.mrf.mxu2  ;;  %v3062_v47 = vpop.f32.mrf.mxu3 }
 0x1ef   : > { %v3054_v39 = vpop.f32.mrf.mxu0  ;;  %v3056_v42 = vpop.f32.mrf.mxu1  ;;  %4515 = vst [vmem:[#allocation21_spill] sm:$0xff] %v3060_v46 }
 0x1f0   : > { %4516 = vst [vmem:[#allocation22_spill] sm:$0xff] %v3062_v47 }
 0x1f3   : > { %2218 = vmatmul.msk.f32.gmra.mxu2 %vm270_vm0, %v643_v19  ;;  %2250 = vmatmul.msk.f32.gmra.mxu3 %vm270_vm0, %v643_v19 }
 0x1f6   : > { %v3074_v59 = vpop.f32.mrf.mxu2  ;;  %v3076_v62 = vpop.f32.mrf.mxu3 }
 0x1f7   : > { %v3064_v50 = vpop.f32.mrf.mxu0  ;;  %v3066_v51 = vpop.f32.mrf.mxu1  ;;  %4519 = vst [vmem:[#allocation25_spill] sm:$0xff] %v3074_v59 }
 0x1f8   : > { %4517 = vst [vmem:[#allocation23_spill] sm:$0xff] %v3064_v50 }
 0x1f9   : > { %4520 = vst [vmem:[#allocation26_spill] sm:$0xff] %v3076_v62 }
 0x1fb   : > { %2219 = vmatmul.msk.f32.gmra.mxu2 %vm270_vm0, %v644_v27  ;;  %2251 = vmatmul.msk.f32.gmra.mxu3 %vm270_vm0, %v644_v27  ;;  %v650_v27 = vpop.trf.xlu1 }
 0x1fe   : > { %v3084_v6 = vpop.f32.mrf.mxu2  ;;  %v3086_v7 = vpop.f32.mrf.mxu3 }
 0x1ff   : > { %v3070_v55 = vpop.f32.mrf.mxu0  ;;  %v3072_v58 = vpop.f32.mrf.mxu1  ;;  %4523 = vst [vmem:[#allocation29_spill] sm:$0xff] %v3084_v6 }
 0x200   : > { %4518 = vst [vmem:[#allocation24_spill] sm:$0xff] %v3070_v55 }
 0x201   : > { %4524 = vst [vmem:[#allocation30_spill] sm:$0xff] %v3086_v7 }
 0x203   : > { %2220 = vmatmul.msk.f32.gmra.mxu2 %vm270_vm0, %v645_v34  ;;  %2252 = vmatmul.msk.f32.gmra.mxu3 %vm270_vm0, %v645_v34  ;;  %v651_v62 = vpop.trf.xlu1 }
 0x206   : > { %v3096_v15 = vpop.f32.mrf.mxu2  ;;  %v3098_v18 = vpop.f32.mrf.mxu3 }
 0x207   : > { %v3080_v63 = vpop.f32.mrf.mxu0  ;;  %v3082_v2 = vpop.f32.mrf.mxu1  ;;  %4525 = vst [vmem:[#allocation31_spill] sm:$0xff] %v3096_v15 }
 0x208   : > { %4521 = vst [vmem:[#allocation27_spill] sm:$0xff] %v3080_v63 }
 0x209   : > { %4522 = vst [vmem:[#allocation28_spill] sm:$0xff] %v3082_v2 }
 0x20a   : > { %4526 = vst [vmem:[#allocation32_spill] sm:$0xff] %v3098_v18 }
 0x20b   : > { %2221 = vmatmul.msk.f32.gmra.mxu2 %vm270_vm0, %v646_v43  ;;  %2253 = vmatmul.msk.f32.gmra.mxu3 %vm270_vm0, %v646_v43 }
 0x20e   : > { %v3106_v34 = vpop.f32.mrf.mxu2  ;;  %v3108_v43 = vpop.f32.mrf.mxu3 }
 0x20f   : > { %v3090_v10 = vpop.f32.mrf.mxu0  ;;  %v3092_v11 = vpop.f32.mrf.mxu1  ;;  %4527 = vst [vmem:[#allocation33_spill] sm:$0xff] %v3106_v34 }
 0x210   : > { %4528 = vst [vmem:[#allocation34_spill] sm:$0xff] %v3108_v43  ;;  %v652_v34 = vpop.trf.xlu1 }
 0x213   : > { %2222 = vmatmul.msk.f32.gmra.mxu2 %vm270_vm0, %v647_v54  ;;  %2254 = vmatmul.msk.f32.gmra.mxu3 %vm270_vm0, %v647_v54 }
 0x216   : > { %v3118_v47 = vpop.f32.mrf.mxu2  ;;  %v3120_v7 = vpop.f32.mrf.mxu3 }
 0x217   : > { %v3100_v19 = vpop.f32.mrf.mxu0  ;;  %v3102_v22 = vpop.f32.mrf.mxu1  ;;  %4530 = vst [vmem:[#allocation36_spill] sm:$0xff] %v3118_v47  ;;  %v979_v47 = vmax.f32 %v2910_v24, %v2926_v32 }
 0x218   : > { %4531 = vst [vmem:[#allocation37_spill] sm:$0xff] %v3120_v7 }
 0x21b   : > { %2223 = vmatmul.msk.f32.gmra.mxu2 %vm270_vm0, %v648_v3  ;;  %2255 = vmatmul.msk.f32.gmra.mxu3 %vm270_vm0, %v648_v3 }
 0x21e   : > { %v3128_v15 = vpop.f32.mrf.mxu2  ;;  %v3130_v46 = vpop.f32.mrf.mxu3 }
 0x21f   : > { %v3110_v38 = vpop.f32.mrf.mxu0  ;;  %v3112_v54 = vpop.f32.mrf.mxu1  ;;  %4532 = vst [vmem:[#allocation38_spill] sm:$0xff] %v3128_v15  ;;  %v980_v15 = vmax.f32 %v2918_v28, %v2934_v36 }
 0x220   : > { %4529 = vst [vmem:[#allocation35_spill] sm:$0xff] %v3112_v54 }
 0x221   : > { %4533 = vst [vmem:[#allocation39_spill] sm:$0xff] %v3130_v46  ;;  %v982_v35 = vmax.f32 %v980_v15, %v2950_v44 }
 0x223   : > { %2224 = vmatmul.msk.f32.gmra.mxu2 %vm270_vm0, %v649_v14  ;;  %2256 = vmatmul.msk.f32.gmra.mxu3 %vm270_vm0, %v649_v14  ;;  %v984_v54 = vmax.f32 %v982_v35, %v2966_v52 }
 0x225   : > { %v986_v36 = vmax.f32 %v984_v54, %v2982_v60 }
 0x226   : > { %v3144_v46 = vpop.f32.mrf.mxu2  ;;  %v3146_v6 = vpop.f32.mrf.mxu3 }
 0x227   : > { %v3116_v18 = vpop.f32.mrf.mxu0  ;;  %v3122_v3 = vpop.f32.mrf.mxu1  ;;  %4536 = vst [vmem:[#allocation42_spill] sm:$0xff] %v3144_v46  ;;  %v988_v15 = vmax.f32 %v986_v36, %v2998_v4 }
 0x228   : > { %4537 = vst [vmem:[#allocation43_spill] sm:$0xff] %v3146_v6 }
 0x229   : > { %v990_v44 = vmax.f32 %v988_v15, %v3014_v12 }
 0x22b   : > { %2225 = vmatmul.msk.f32.gmra.mxu2 %vm270_vm0, %v650_v27  ;;  %2257 = vmatmul.msk.f32.gmra.mxu3 %vm270_vm0, %v650_v27  ;;  %v653_v27 = vpop.trf.xlu1  ;;  %v992_v60 = vmax.f32 %v990_v44, %v3030_v20 }
 0x22d   : > { %v994_v36 = vmax.f32 %v992_v60, %v3044_v30  ;;  %v1016_v60 = vmax.f32 %v2912_v25, %v2928_v33 }
 0x22e   : > { %v3166_v35 = vpop.f32.mrf.mxu3 }
 0x22f   : > { %v3126_v43 = vpop.f32.mrf.mxu0  ;;  %v3134_v14 = vpop.f32.mrf.mxu1  ;;  %4539 = vst [vmem:[#allocation45_spill] sm:$0xff] %v3166_v35  ;;  %v996_v15 = vmax.f32 %v994_v36, %v3064_v50  ;;  %v1017_v35 = vmax.f32 %v2920_v29, %v2936_v37 }
 0x230   : > { %4534 = vst [vmem:[#allocation40_spill] sm:$0xff] %v3134_v14 }
 0x231   : > { %v998_v44 = vmax.f32 %v996_v15, %v3080_v63  ;;  %v1019_v30 = vmax.f32 %v1017_v35, %v2952_v45 }
 0x233   : > { %2226 = vmatmul.msk.f32.gmra.mxu2 %vm270_vm0, %v651_v62  ;;  %2258 = vmatmul.msk.f32.gmra.mxu3 %vm270_vm0, %v651_v62  ;;  %v981_v62 = vmax.f32 %v979_v47, %v2942_v40  ;;  %v654_v6 = vpop.trf.xlu1  ;;  %v1021_v15 = vmax.f32 %v1019_v30, %v2968_v53 }
 0x236   : > { %v3193_v50 = vpop.f32.mrf.mxu3 }
 0x237   : > { %v3136_v7 = vpop.f32.mrf.mxu0  ;;  %v3150_v59 = vpop.f32.mrf.mxu1  ;;  %4542 = vst [vmem:[#allocation48_spill] sm:$0xff] %v3193_v50 }
 0x238   : > { %4535 = vst [vmem:[#allocation41_spill] sm:$0xff] %v3136_v7 }
 0x23b   : > { %2227 = vmatmul.msk.f32.gmra.mxu2 %vm270_vm0, %v652_v34  ;;  %2259 = vmatmul.msk.f32.gmra.mxu3 %vm270_vm0, %v652_v34  ;;  %v983_v34 = vmax.f32 %v981_v62, %v2958_v48  ;;  %v3164_v62 = vpop.f32.mrf.mxu2 }
 0x23c   : > { %4538 = vst [vmem:[#allocation44_spill] sm:$0xff] %v3164_v62 }
 0x23d   : > { %v985_v32 = vmax.f32 %v983_v34, %v2974_v56 }
 0x23f   : > { %v3152_v14 = vpop.f32.mrf.mxu0  ;;  %v987_v47 = vmax.f32 %v985_v32, %v2990_v0 }
 0x241   : > { %v989_v46 = vmax.f32 %v987_v47, %v3006_v8 }
 0x243   : > { %2228 = vmatmul.msk.f32.gmra.mxu2 %vm270_vm0, %v653_v27  ;;  %2260 = vmatmul.msk.f32.gmra.mxu3 %vm270_vm0, %v653_v27  ;;  %v991_v54 = vmax.f32 %v989_v46, %v3022_v16  ;;  %v3172_v27 = vpop.f32.mrf.mxu1  ;;  %v3191_v36 = vpop.f32.mrf.mxu2 }
 0x244   : > { %4541 = vst [vmem:[#allocation47_spill] sm:$0xff] %v3191_v36 }
 0x245   : > { %v993_v32 = vmax.f32 %v991_v54, %v3038_v23  ;;  %v655_v54 = vpop.trf.xlu1 }
 0x247   : > { %v3168_v34 = vpop.f32.mrf.mxu0  ;;  %v995_v47 = vmax.f32 %v993_v32, %v3054_v39  ;;  %v1000_v32 = vmax.f32 %v998_v44, %v3100_v19 }
 0x248   : > { %4540 = vst [vmem:[#allocation46_spill] sm:$0xff] %v3168_v34 }
 0x249   : > { %v997_v46 = vmax.f32 %v995_v47, %v3070_v55  ;;  %v1018_v47 = vmax.f32 %v1016_v60, %v2944_v41  ;;  %v1002_v55 = vmax.f32 %v1000_v32, %v3116_v18 }
 0x24b   : > { %2229 = vmatmul.msk.f32.gmra.mxu2 %vm270_vm0, %v654_v6  ;;  %2261 = vmatmul.msk.f32.gmra.mxu3 %vm270_vm0, %v654_v6  ;;  %v999_v6 = vmax.f32 %v997_v46, %v3090_v10  ;;  %v3199_v37 = vpop.f32.mrf.mxu1  ;;  %v1020_v35 = vmax.f32 %v1018_v47, %v2960_v49  ;;  %v1023_v46 = vmax.f32 %v1021_v15, %v2984_v61 }
 0x24c   : > { %4543 = vst [vmem:[#allocation49_spill] sm:$0xff] %v3199_v37  ;;  %v1004_v60 = vmax.f32 %v1002_v55, %v3136_v7  ;;  %v3219_v7 = vpop.f32.mrf.mxu2 }
 0x24d   : > { %v1001_v63 = vmax.f32 %v999_v6, %v3110_v38  ;;  %v1022_v30 = vmax.f32 %v1020_v35, %v2976_v57  ;;  %v1025_v6 = vmax.f32 %v1023_v46, %v3000_v5  ;;  %4544 = vst [vmem:[#allocation50_spill] sm:$0xff] %v3219_v7  ;;  %v3221_v46 = vpop.f32.mrf.mxu3 }
 0x24e   : > { %v1006_v50 = vmax.f32 %v1004_v60, %v3168_v34  ;;  %4545 = vst [vmem:[#allocation51_spill] sm:$0xff] %v3221_v46 }
 0x24f   : > { %v3184_v62 = vpop.f32.mrf.mxu0  ;;  %v1003_v44 = vmax.f32 %v1001_v63, %v3126_v43  ;;  %v1027_v47 = vmax.f32 %v1025_v6, %v3016_v13 }
 0x251   : > { %v1005_v32 = vmax.f32 %v1003_v44, %v3152_v14  ;;  %v1029_v35 = vmax.f32 %v1027_v47, %v3032_v21 }
 0x253   : > { %2230 = vmatmul.msk.f32.gmra.mxu2 %vm270_vm0, %v655_v54  ;;  %2262 = vmatmul.msk.f32.gmra.mxu3 %vm270_vm0, %v655_v54  ;;  %v1024_v54 = vmax.f32 %v1022_v30, %v2992_v1  ;;  %v1007_v15 = vmax.f32 %v1005_v32, %v3184_v62  ;;  %v1031_v34 = vmax.f32 %v1029_v35, %v3046_v31  ;;  %v3225_v5 = vpop.f32.mrf.mxu1 }
 0x254   : > { %4546 = vst [vmem:[#allocation52_spill] sm:$0xff] %v3225_v5  ;;  %v3235_v31 = vpop.f32.mrf.mxu2 }
 0x255   : > { %v1026_v55 = vmax.f32 %v1024_v54, %v3008_v9  ;;  %4547 = vst [vmem:[#allocation53_spill] sm:$0xff] %v3235_v31 }
 0x257   : > { %v3211_v36 = vpop.f32.mrf.mxu0  ;;  %v1028_v60 = vmax.f32 %v1026_v55, %v3024_v17 }
 0x258   : > { %v1008_v63 = vmax.f32 %v1006_v50, %v3211_v36  ;;  %v1033_v50 = vmax.f32 %v1031_v34, %v3066_v51 }
 0x259   : > { %v1030_v6 = vmax.f32 %v1028_v60, %v3040_v26  ;;  %v3237_v60 = vpop.f32.mrf.mxu3 }
 0x25a   : > { %v1009_v44 = vmax.f32 %v1007_v15, %v1008_v63  ;;  %v1035_v47 = vmax.f32 %v1033_v50, %v3082_v2  ;;  %4548 = vst [vmem:[#allocation54_spill] sm:$0xff] %v3237_v60  ;;  %v4551_v2 = vld [vmem:[#allocation40_spill] sm:$0xff] }
 0x25b   : > { %v1032_v54 = vmax.f32 %v1030_v6, %v3056_v42  ;;  %v3241_v50 = vpop.f32.mrf.mxu1 }
 0x25c   : > { %v1010_v30 = vrot.slane %v1009_v44, 4  ;;  %v1037_v15 = vmax.f32 %v1035_v47, %v3102_v22 }
 0x25d   : > { %v1034_v46 = vmax.f32 %v1032_v54, %v3072_v58 }
 0x25e   : > { %v1011_v32 = vmax.f32 %v1009_v44, %v1010_v30  ;;  %v1039_v35 = vmax.f32 %v1037_v15, %v3122_v3  ;;  %v4549_v44 = vld [vmem:[#allocation35_spill] sm:$0xff] }
 0x25f   : > { %v1036_v55 = vmax.f32 %v1034_v46, %v3092_v11  ;;  %4550 = vst [vmem:[#allocation35_spill] sm:$0xff] %v3241_v50 }
 0x260   : > { %v1012_v7 = vrot.slane %v1011_v32, 2  ;;  %v1041_v6 = vmax.f32 %v1039_v35, %v3150_v59  ;;  %v4552_v35 = vld [vmem:[#allocation11_spill] sm:$0xff] }
 0x261   : > { %v1038_v30 = vmax.f32 %v1036_v55, %v4549_v44 }
 0x262   : > { %v1013_v63 = vmax.f32 %v1011_v32, %v1012_v7  ;;  %v1043_v47 = vmax.f32 %v1041_v6, %v3199_v37  ;;  %v3258_v6 = vpop.f32.mrf.mxu3 }
 0x263   : > { %v1040_v54 = vmax.f32 %v1038_v30, %v4551_v2  ;;  %v3256_v30 = vpop.f32.mrf.mxu2  ;;  %4553 = vst [vmem:[#allocation40_spill] sm:$0xff] %v3258_v6 }
 0x264   : > { %v1014_v34 = vrot.slane %v1013_v63, 1  ;;  %v1045_v32 = vmax.f32 %v1043_v47, %v3241_v50 }
 0x265   : > { %v1042_v46 = vmax.f32 %v1040_v54, %v3172_v27 }
 0x266   : > { %v3245_v7 = vmax.f32 %v1013_v63, %v1014_v34  ;;  %v4554_v34 = vld [vmem:[#allocation12_spill] sm:$0xff] }
 0x267   : > { %v1044_v15 = vmax.f32 %v1042_v46, %v3225_v5 }
 0x268   : > { %v1053_v60 = vsub.f32 %v2910_v24, %v3245_v7  ;;  %v1055_v55 = vsub.f32 %v2918_v28, %v3245_v7  ;;  %v1057_v31 = vsub.f32 %v4552_v35, %v3245_v7  ;;  %v1059_v54 = vsub.f32 %v4554_v34, %v3245_v7  ;;  %v4555_v28 = vld [vmem:[#allocation14_spill] sm:$0xff] }
 0x269   : > { %v1046_v63 = vmax.f32 %v1044_v15, %v1045_v32  ;;  %v1061_v46 = vsub.f32 %v2942_v40, %v3245_v7  ;;  %v1063_v37 = vsub.f32 %v4555_v28, %v3245_v7  ;;  %v1065_v6 = vsub.f32 %v2958_v48, %v3245_v7 }
 0x26a   : > { %v1117_v47 = vmul.f32 1.442695, %v1053_v60  ;;  %v1121_v50 = vmul.f32 1.442695, %v1055_v55  ;;  %v1125_v24 = vmul.f32 1.442695, %v1057_v31  ;;  %v1067_v60 = vsub.f32 %v2966_v52, %v3245_v7  ;;  %v3274_v34 = vpop.f32.mrf.mxu3 }
 0x26b   : > { %v1047_v5 = vrot.slane %v1046_v63, 4  ;;  %v1129_v35 = vmul.f32 1.442695, %v1059_v54  ;;  %v1133_v32 = vmul.f32 1.442695, %v1061_v46  ;;  %v3272_v31 = vpop.f32.mrf.mxu2 }
 0x26c   : > { %2326 = vpow2.f32 %v1117_v47  ;;  %v1137_v55 = vmul.f32 1.442695, %v1063_v37  ;;  %v1141_v48 = vmul.f32 1.442695, %v1065_v6  ;;  %v4559_v37 = vld [vmem:[#allocation15_spill] sm:$0xff] }
 0x26d   : > { %2328 = vpow2.f32 %v1121_v50  ;;  %v1048_v15 = vmax.f32 %v1046_v63, %v1047_v5  ;;  %v1069_v50 = vsub.f32 %v2974_v56, %v3245_v7  ;;  %v1071_v54 = vsub.f32 %v4559_v37, %v3245_v7 }
 0x26e   : > { %2330 = vpow2.f32 %v1125_v24  ;;  %v1145_v46 = vmul.f32 1.442695, %v1067_v60  ;;  %v1073_v56 = vsub.f32 %v2990_v0, %v3245_v7  ;;  %v1075_v37 = vsub.f32 %v2998_v4, %v3245_v7 }
 0x26f   : > { %2332 = vpow2.f32 %v1129_v35  ;;  %v1049_v63 = vrot.slane %v1048_v15, 2  ;;  %v1149_v6 = vmul.f32 1.442695, %v1069_v50  ;;  %v1153_v60 = vmul.f32 1.442695, %v1071_v54 }
 0x270   : > { %2334 = vpow2.f32 %v1133_v32  ;;  %v1077_v50 = vsub.f32 %v3006_v8, %v3245_v7  ;;  %v1081_v8 = vsub.f32 %v3022_v16, %v3245_v7  ;;  %v4566_v16 = vld [vmem:[#allocation17_spill] sm:$0xff] }
 0x271   : > { %2336 = vpow2.f32 %v1137_v55  ;;  %v1050_v32 = vmax.f32 %v1048_v15, %v1049_v63  ;;  %v1157_v15 = vmul.f32 1.442695, %v1073_v56 }
 0x272   : > { %v3270_v40 = vpop.eup %2326  ;;  %2338 = vpow2.f32 %v1141_v48  ;;  %v3306_v4 = vpop.f32.mrf.mxu3  ;;  %v1165_v56 = vmul.f32 1.442695, %v1077_v50  ;;  %v1087_v50 = vsub.f32 %v4566_v16, %v3245_v7 }
 0x273   : > { %4556 = vst [vmem:[#allocation11_spill] sm:$0xff] %v3270_v40  ;;  %v3276_v47 = vpop.eup %2328  ;;  %2340 = vpow2.f32 %v1145_v46  ;;  %v3304_v63 = vpop.f32.mrf.mxu2  ;;  %v1161_v46 = vmul.f32 1.442695, %v1075_v37 }
 0x274   : > { %4557 = vst [vmem:[#allocation12_spill] sm:$0xff] %v3276_v47  ;;  %v1245_v5 = vadd.f32 %v3276_v47, %v3270_v40  ;;  %v3282_v52 = vpop.eup %2330  ;;  %v656_v40 = vpop.trf.xlu1  ;;  %2342 = vpow2.f32 %v1149_v6 }
 0x275   : > { %4558 = vst [vmem:[#allocation14_spill] sm:$0xff] %v3282_v52  ;;  %v3287_v28 = vpop.eup %2332  ;;  %2231 = vmatmul.msk.f32.gmra.mxu2 %vm270_vm0, %v656_v40  ;;  %2263 = vmatmul.msk.f32.gmra.mxu3 %vm270_vm0, %v656_v40  ;;  %v1079_v40 = vsub.f32 %v3014_v12, %v3245_v7  ;;  %2344 = vpow2.f32 %v1153_v60  ;;  %v1083_v12 = vsub.f32 %v3030_v20, %v3245_v7 }
 0x276   : > { %v1246_v24 = vadd.f32 %v3282_v52, %v1245_v5  ;;  %4560 = vst [vmem:[#allocation15_spill] sm:$0xff] %v3287_v28  ;;  %v3292_v47 = vpop.eup %2334  ;;  %v1051_v5 = vrot.slane %v1050_v32, 1  ;;  %2346 = vpow2.f32 %v1157_v15  ;;  %v1085_v60 = vsub.f32 %v3038_v23, %v3245_v7 }
 0x277   : > { %4561 = vst [vmem:[#allocation55_spill] sm:$0xff] %v3292_v47  ;;  %v3299_v0 = vpop.eup %2336  ;;  %2348 = vpow2.f32 %v1161_v46  ;;  %v1169_v37 = vmul.f32 1.442695, %v1079_v40  ;;  %v1177_v23 = vmul.f32 1.442695, %v1083_v12 }
 0x278   : > { %v1247_v35 = vadd.f32 %v3287_v28, %v1246_v24  ;;  %4562 = vst [vmem:[#allocation56_spill] sm:$0xff] %v3299_v0  ;;  %v3308_v54 = vpop.eup %2338  ;;  %2350 = vpow2.f32 %v1165_v56  ;;  %v1089_v56 = vsub.f32 %v3054_v39, %v3245_v7  ;;  %v4568_v39 = vld [vmem:[#allocation13_spill] sm:$0xff] }
 0x279   : > { %4563 = vst [vmem:[#allocation57_spill] sm:$0xff] %v3308_v54  ;;  %2352 = vpow2.f32 %v1169_v37 }
 0x27a   : > { %v1248_v55 = vadd.f32 %v3292_v47, %v1247_v35  ;;  %v3313_v35 = vpop.eup %2340  ;;  %v3336_v40 = vpop.f32.mrf.mxu3  ;;  %v4567_v47 = vld [vmem:[#allocation23_spill] sm:$0xff] }
 0x27b   : > { %4564 = vst [vmem:[#allocation58_spill] sm:$0xff] %v3313_v35  ;;  %v3320_v52 = vpop.eup %2342  ;;  %v3334_v20 = vpop.f32.mrf.mxu2  ;;  %v1091_v37 = vsub.f32 %v4567_v47, %v3245_v7 }
 0x27c   : > { %v1249_v48 = vadd.f32 %v3299_v0, %v1248_v55  ;;  %v3318_v55 = vmax.f32 %v1050_v32, %v1051_v5  ;;  %4565 = vst [vmem:[#allocation59_spill] sm:$0xff] %v3320_v52  ;;  %v3327_v28 = vpop.eup %2344  ;;  %v1173_v32 = vmul.f32 1.442695, %v1081_v8  ;;  %v1181_v8 = vmul.f32 1.442695, %v1085_v60 }
 0x27d   : > { %v3338_v46 = vpop.eup %2346 }
 0x27e   : > { %v1250_v24 = vadd.f32 %v3308_v54, %v1249_v48  ;;  %v1054_v5 = vsub.f32 %v2912_v25, %v3318_v55  ;;  %2354 = vpow2.f32 %v1173_v32  ;;  %v1185_v25 = vmul.f32 1.442695, %v1087_v50  ;;  %v4569_v54 = vld [vmem:[#allocation24_spill] sm:$0xff] }
 0x27f   : > { %v1058_v16 = vsub.f32 %v2928_v33, %v3318_v55  ;;  %2356 = vpow2.f32 %v1177_v23  ;;  %v1060_v60 = vsub.f32 %v4568_v39, %v3318_v55  ;;  %v1093_v32 = vsub.f32 %v4569_v54, %v3245_v7  ;;  %v4570_v23 = vld [vmem:[#allocation27_spill] sm:$0xff] }
 0x280   : > { %v1251_v6 = vadd.f32 %v3313_v35, %v1250_v24  ;;  %v1056_v24 = vsub.f32 %v2920_v29, %v3318_v55  ;;  %v1119_v0 = vmul.f32 1.442695, %v1054_v5  ;;  %2358 = vpow2.f32 %v1181_v8 }
 0x281   : > { %v1189_v50 = vmul.f32 1.442695, %v1089_v56  ;;  %2360 = vpow2.f32 %v1185_v25  ;;  %v1062_v47 = vsub.f32 %v2944_v41, %v3318_v55  ;;  %v1127_v5 = vmul.f32 1.442695, %v1058_v16 }
 0x282   : > { %v1252_v48 = vadd.f32 %v3320_v52, %v1251_v6  ;;  %v1193_v52 = vmul.f32 1.442695, %v1091_v37  ;;  %2362 = vpow2.f32 %v1119_v0  ;;  %v3368_v54 = vpop.f32.mrf.mxu3  ;;  %v1064_v8 = vsub.f32 %v2952_v45, %v3318_v55 }
 0x283   : > { %v3366_v39 = vpop.f32.mrf.mxu2  ;;  %4571 = vst [vmem:[#allocation17_spill] sm:$0xff] %v3368_v54  ;;  %v1131_v25 = vmul.f32 1.442695, %v1060_v60  ;;  %v1097_v41 = vsub.f32 %v3090_v10, %v3245_v7  ;;  %v1197_v16 = vmul.f32 1.442695, %v1093_v32  ;;  %v1066_v0 = vsub.f32 %v2960_v49, %v3318_v55 }
 0x284   : > { %v1253_v15 = vadd.f32 %v3327_v28, %v1252_v48  ;;  %v3345_v48 = vpop.eup %2348  ;;  %v1099_v45 = vsub.f32 %v3100_v19, %v3245_v7  ;;  %v1068_v32 = vsub.f32 %v2968_v53, %v3318_v55  ;;  %v1101_v49 = vsub.f32 %v3110_v38, %v3245_v7 }
 0x285   : > { %v3352_v29 = vpop.eup %2350  ;;  %v1143_v53 = vmul.f32 1.442695, %v1066_v0 }
 0x286   : > { %v1254_v6 = vadd.f32 %v3338_v46, %v1253_v15  ;;  %v1123_v15 = vmul.f32 1.442695, %v1056_v24  ;;  %v3359_v35 = vpop.eup %2352  ;;  %v1147_v0 = vmul.f32 1.442695, %v1068_v32 }
 0x287   : > { %v3370_v56 = vpop.eup %2354 }
 0x288   : > { %v1255_v12 = vadd.f32 %v3345_v48, %v1254_v6  ;;  %v1095_v6 = vsub.f32 %v4570_v23, %v3245_v7  ;;  %2364 = vpow2.f32 %v1123_v15 }
 0x289   : > { %2366 = vpow2.f32 %v1189_v50  ;;  %v1139_v50 = vmul.f32 1.442695, %v1064_v8 }
 0x28a   : > { %v1256_v33 = vadd.f32 %v3352_v29, %v1255_v12  ;;  %v3377_v12 = vpop.eup %2356  ;;  %2368 = vpow2.f32 %v1127_v5  ;;  %v1201_v60 = vmul.f32 1.442695, %v1095_v6  ;;  %v1103_v5 = vsub.f32 %v3116_v18, %v3245_v7 }
 0x28b   : > { %v3381_v23 = vpop.eup %2358  ;;  %2370 = vpow2.f32 %v1193_v52  ;;  %v1070_v6 = vsub.f32 %v2976_v57, %v3318_v55  ;;  %v1105_v57 = vsub.f32 %v3126_v43, %v3245_v7  ;;  %v1072_v18 = vsub.f32 %v2984_v61, %v3318_v55 }
 0x28c   : > { %v1257_v24 = vadd.f32 %v3359_v35, %v1256_v33  ;;  %v1135_v33 = vmul.f32 1.442695, %v1062_v47  ;;  %4572 = vst [vmem:[#allocation23_spill] sm:$0xff] %v3381_v23  ;;  %v3386_v15 = vpop.eup %2360  ;;  %2372 = vpow2.f32 %v1131_v25  ;;  %v1205_v47 = vmul.f32 1.442695, %v1097_v41 }
 0x28d   : > { %4573 = vst [vmem:[#allocation13_spill] sm:$0xff] %v3386_v15  ;;  %2374 = vpow2.f32 %v1197_v16  ;;  %v1209_v25 = vmul.f32 1.442695, %v1099_v45  ;;  %v3406_v16 = vpop.f32.mrf.mxu2  ;;  %v1213_v45 = vmul.f32 1.442695, %v1101_v49  ;;  %v1074_v43 = vsub.f32 %v2992_v1, %v3318_v55 }
 0x28e   : > { %v1258_v37 = vadd.f32 %v3370_v56, %v1257_v24  ;;  %v3390_v24 = vpop.eup %2362  ;;  %2376 = vpow2.f32 %v1135_v33  ;;  %v1151_v61 = vmul.f32 1.442695, %v1070_v6  ;;  %v1217_v32 = vmul.f32 1.442695, %v1103_v5 }
 0x28f   : > { %4574 = vst [vmem:[#allocation24_spill] sm:$0xff] %v3390_v24  ;;  %v3395_v52 = vpop.eup %2364  ;;  %2378 = vpow2.f32 %v1201_v60  ;;  %v1155_v1 = vmul.f32 1.442695, %v1072_v18  ;;  %v1221_v6 = vmul.f32 1.442695, %v1105_v57 }
 0x290   : > { %v1259_v10 = vadd.f32 %v3377_v12, %v1258_v37  ;;  %4575 = vst [vmem:[#allocation27_spill] sm:$0xff] %v3395_v52  ;;  %v3401_v8 = vpop.eup %2366  ;;  %v1282_v41 = vadd.f32 %v3395_v52, %v3390_v24  ;;  %v3408_v37 = vpop.f32.mrf.mxu3  ;;  %2380 = vpow2.f32 %v1139_v50 }
 0x291   : > { %4576 = vst [vmem:[#allocation60_spill] sm:$0xff] %v3401_v8  ;;  %2382 = vpow2.f32 %v1205_v47 }
 0x292   : > { %v1260_v19 = vadd.f32 %v3381_v23, %v1259_v10  ;;  %v3410_v10 = vpop.eup %2368  ;;  %v4580_v23 = vld [vmem:[#allocation41_spill] sm:$0xff]  ;;  %2384 = vpow2.f32 %v1143_v53 }
 0x293   : > { %4577 = vst [vmem:[#allocation61_spill] sm:$0xff] %v3410_v10  ;;  %v3416_v33 = vpop.eup %2370  ;;  %v1107_v52 = vsub.f32 %v4580_v23, %v3245_v7  ;;  %2386 = vpow2.f32 %v1209_v25  ;;  %v4583_v23 = vld [vmem:[#allocation16_spill] sm:$0xff] }
 0x294   : > { %v1261_v38 = vadd.f32 %v3386_v15, %v1260_v19  ;;  %4578 = vst [vmem:[#allocation62_spill] sm:$0xff] %v3416_v33  ;;  %v1283_v19 = vadd.f32 %v3410_v10, %v1282_v41  ;;  %v3420_v24 = vpop.eup %2372  ;;  %v1109_v41 = vsub.f32 %v3152_v14, %v3245_v7  ;;  %v1076_v15 = vsub.f32 %v4583_v23, %v3318_v55 }
 0x295   : > { %4579 = vst [vmem:[#allocation63_spill] sm:$0xff] %v3420_v24  ;;  %v3426_v50 = vpop.eup %2374  ;;  %2388 = vpow2.f32 %v1147_v0  ;;  %v1078_v14 = vsub.f32 %v3008_v9, %v3318_v55  ;;  %v1159_v23 = vmul.f32 1.442695, %v1074_v43  ;;  %v1225_v18 = vmul.f32 1.442695, %v1107_v52 }
 0x296   : > { %v1262_v60 = vadd.f32 %v3401_v8, %v1261_v38  ;;  %4581 = vst [vmem:[#allocation41_spill] sm:$0xff] %v3426_v50  ;;  %v1284_v47 = vadd.f32 %v3420_v24, %v1283_v19  ;;  %v3430_v38 = vpop.eup %2376  ;;  %2390 = vpow2.f32 %v1213_v45  ;;  %v4586_v19 = vld [vmem:[#allocation46_spill] sm:$0xff]  ;;  %v1080_v9 = vsub.f32 %v3016_v13, %v3318_v55 }
 0x297   : > { %4582 = vst [vmem:[#allocation64_spill] sm:$0xff] %v3430_v38  ;;  %v3436_v53 = vpop.eup %2378  ;;  %v1111_v10 = vsub.f32 %v4586_v19, %v3245_v7  ;;  %2392 = vpow2.f32 %v1151_v61  ;;  %v1113_v19 = vsub.f32 %v3184_v62, %v3245_v7  ;;  %v1163_v43 = vmul.f32 1.442695, %v1076_v15 }
 0x298   : > { %v1263_v49 = vadd.f32 %v3416_v33, %v1262_v60  ;;  %4584 = vst [vmem:[#allocation16_spill] sm:$0xff] %v3436_v53  ;;  %v1285_v25 = vadd.f32 %v3430_v38, %v1284_v47  ;;  %v3440_v60 = vpop.eup %2380  ;;  %2394 = vpow2.f32 %v1217_v32  ;;  %v3452_v47 = vpop.f32.mrf.mxu3  ;;  %v1229_v52 = vmul.f32 1.442695, %v1109_v41 }
 0x299   : > { %4585 = vst [vmem:[#allocation65_spill] sm:$0xff] %v3440_v60  ;;  %v3446_v0 = vpop.eup %2382  ;;  %2396 = vpow2.f32 %v1155_v1  ;;  %v1115_v24 = vsub.f32 %v3211_v36, %v3245_v7  ;;  %v1082_v62 = vsub.f32 %v3024_v17, %v3318_v55  ;;  %v1167_v13 = vmul.f32 1.442695, %v1078_v14 }
 0x29a   : > { %v1264_v5 = vadd.f32 %v3426_v50, %v1263_v49  ;;  %4587 = vst [vmem:[#allocation46_spill] sm:$0xff] %v3446_v0  ;;  %v1286_v45 = vadd.f32 %v3440_v60, %v1285_v25  ;;  %v3450_v49 = vpop.f32.mrf.mxu2  ;;  %v3454_v8 = vpop.eup %2384  ;;  %2398 = vpow2.f32 %v1221_v6  ;;  %v1233_v15 = vmul.f32 1.442695, %v1111_v10 }
 0x29b   : > { %4588 = vst [vmem:[#allocation66_spill] sm:$0xff] %v3454_v8  ;;  %v3460_v61 = vpop.eup %2386  ;;  %2400 = vpow2.f32 %v1159_v23  ;;  %v1171_v36 = vmul.f32 1.442695, %v1080_v9  ;;  %v1237_v17 = vmul.f32 1.442695, %v1113_v19 }
 0x29c   : > { %v1265_v57 = vadd.f32 %v3436_v53, %v1264_v5  ;;  %4589 = vst [vmem:[#allocation67_spill] sm:$0xff] %v3460_v61  ;;  %v1287_v5 = vadd.f32 %v3454_v8, %v1286_v45  ;;  %v3464_v25 = vpop.eup %2388  ;;  %2402 = vpow2.f32 %v1225_v18  ;;  %v1084_v45 = vsub.f32 %v3032_v21, %v3318_v55 }
 0x29d   : > { %4590 = vst [vmem:[#allocation68_spill] sm:$0xff] %v3464_v25  ;;  %v3470_v1 = vpop.eup %2390  ;;  %2404 = vpow2.f32 %v1163_v43  ;;  %v1086_v18 = vsub.f32 %v3040_v26, %v3318_v55  ;;  %v1241_v21 = vmul.f32 1.442695, %v1115_v24 }
 0x29e   : > { %v1266_v32 = vadd.f32 %v3446_v0, %v1265_v57  ;;  %4591 = vst [vmem:[#allocation69_spill] sm:$0xff] %v3470_v1  ;;  %v1288_v6 = vadd.f32 %v3464_v25, %v1287_v5  ;;  %v3474_v57 = vpop.eup %2392  ;;  %2406 = vpow2.f32 %v1229_v52  ;;  %v1179_v26 = vmul.f32 1.442695, %v1084_v45 }
 0x29f   : > { %4592 = vst [vmem:[#allocation70_spill] sm:$0xff] %v3474_v57  ;;  %v3478_v7 = vpop.eup %2394  ;;  %2408 = vpow2.f32 %v1167_v13  ;;  %v1098_v0 = vsub.f32 %v3092_v11, %v3318_v55 }
 0x2a0   : > { %v1267_v41 = vadd.f32 %v3460_v61, %v1266_v32  ;;  %v1289_v23 = vadd.f32 %v3474_v57, %v1288_v6  ;;  %v3482_v10 = vpop.eup %2396  ;;  %v1175_v32 = vmul.f32 1.442695, %v1082_v62  ;;  %2410 = vpow2.f32 %v1233_v15  ;;  %v3492_v52 = vpop.f32.mrf.mxu3  ;;  %v4593_v6 = vld [vmem:[#allocation18_spill] sm:$0xff] }
 0x2a1   : > { %v3486_v5 = vpop.eup %2398  ;;  %v1088_v33 = vsub.f32 %v4593_v6, %v3318_v55  ;;  %2412 = vpow2.f32 %v1171_v36  ;;  %v1207_v11 = vmul.f32 1.442695, %v1098_v0 }
 0x2a2   : > { %v1268_v14 = vadd.f32 %v3470_v1, %v1267_v41  ;;  %v1290_v43 = vadd.f32 %v3482_v10, %v1289_v23  ;;  %v3490_v19 = vpop.f32.mrf.mxu2  ;;  %v3494_v41 = vpop.eup %2400  ;;  %2414 = vpow2.f32 %v1237_v17  ;;  %v1183_v23 = vmul.f32 1.442695, %v1086_v18 }
 0x2a3   : > { %v3498_v62 = vpop.eup %2402  ;;  %2416 = vpow2.f32 %v1175_v32  ;;  %v1092_v17 = vsub.f32 %v3066_v51, %v3318_v55 }
 0x2a4   : > { %v1269_v9 = vadd.f32 %v3478_v7, %v1268_v14  ;;  %v1291_v13 = vadd.f32 %v3494_v41, %v1290_v43  ;;  %v3502_v15 = vpop.eup %2404  ;;  %v1090_v14 = vsub.f32 %v3056_v42, %v3318_v55  ;;  %2418 = vpow2.f32 %v1241_v21 }
 0x2a5   : > { %v3506_v38 = vpop.eup %2406  ;;  %2420 = vpow2.f32 %v1179_v26  ;;  %v1094_v21 = vsub.f32 %v3072_v58, %v3318_v55  ;;  %v1195_v53 = vmul.f32 1.442695, %v1092_v17 }
 0x2a6   : > { %v1270_v24 = vadd.f32 %v3486_v5, %v1269_v9  ;;  %v1292_v45 = vadd.f32 %v3502_v15, %v1291_v13  ;;  %v3510_v6 = vpop.eup %2408  ;;  %v1187_v9 = vmul.f32 1.442695, %v1088_v33  ;;  %2422 = vpow2.f32 %v1183_v23 }
 0x2a7   : > { %v3514_v43 = vpop.eup %2410 }
 0x2a8   : > { %v1271_v36 = vadd.f32 %v3498_v62, %v1270_v24  ;;  %v1293_v18 = vadd.f32 %v3510_v6, %v1292_v45  ;;  %v3518_v32 = vpop.eup %2412  ;;  %v1191_v24 = vmul.f32 1.442695, %v1090_v14  ;;  %v3528_v26 = vpop.f32.mrf.mxu3  ;;  %v4595_v45 = vld [vmem:[#allocation28_spill] sm:$0xff]  ;;  %2424 = vpow2.f32 %v1187_v9 }
 0x2a9   : > { %v3522_v13 = vpop.eup %2414  ;;  %4594 = vst [vmem:[#allocation18_spill] sm:$0xff] %v3528_v26  ;;  %v1096_v60 = vsub.f32 %v4595_v45, %v3318_v55 }
 0x2aa   : > { %v1272_v42 = vadd.f32 %v3506_v38, %v1271_v36  ;;  %v1294_v51 = vadd.f32 %v3518_v32, %v1293_v18  ;;  %v3526_v33 = vpop.f32.mrf.mxu2  ;;  %v3530_v36 = vpop.eup %2416  ;;  %2426 = vpow2.f32 %v1191_v24  ;;  %v1199_v18 = vmul.f32 1.442695, %v1094_v21 }
 0x2ab   : > { %v3534_v58 = vpop.eup %2418  ;;  %2428 = vpow2.f32 %v1195_v53  ;;  %v1203_v17 = vmul.f32 1.442695, %v1096_v60  ;;  %v1102_v24 = vsub.f32 %v4549_v44, %v3318_v55  ;;  %v1106_v44 = vsub.f32 %v4551_v2, %v3318_v55 }
 0x2ac   : > { %v1273_v50 = vadd.f32 %v3514_v43, %v1272_v42  ;;  %v1295_v23 = vadd.f32 %v3530_v36, %v1294_v51  ;;  %v3538_v42 = vpop.eup %2420  ;;  %2430 = vpow2.f32 %v1199_v18  ;;  %v1110_v2 = vsub.f32 %v3172_v27, %v3318_v55 }
 0x2ad   : > { %v3544_v45 = vpop.eup %2422  ;;  %2432 = vpow2.f32 %v1203_v17 }
 0x2ae   : > { %v1274_v14 = vadd.f32 %v3522_v13, %v1273_v50  ;;  %v1296_v25 = vadd.f32 %v3538_v42, %v1295_v23  ;;  %4596 = vst [vmem:[#allocation28_spill] sm:$0xff] %v3544_v45  ;;  %v1100_v50 = vsub.f32 %v3102_v22, %v3318_v55  ;;  %v3549_v61 = vpop.eup %2424  ;;  %v1104_v22 = vsub.f32 %v3122_v3, %v3318_v55 }
 0x2af   : > { %4597 = vst [vmem:[#allocation71_spill] sm:$0xff] %v3549_v61  ;;  %2434 = vpow2.f32 %v1207_v11  ;;  %v1108_v3 = vsub.f32 %v3150_v59, %v3318_v55  ;;  %v4603_v59 = vld [vmem:[#allocation49_spill] sm:$0xff] }
 0x2b0   : > { %v1275_v8 = vadd.f32 %v3534_v58, %v1274_v14  ;;  %v1297_v51 = vadd.f32 %v3544_v45, %v1296_v25  ;;  %v3556_v53 = vpop.f32.mrf.mxu3  ;;  %v3558_v60 = vpop.eup %2426  ;;  %v1211_v45 = vmul.f32 1.442695, %v1100_v50  ;;  %v1219_v57 = vmul.f32 1.442695, %v1104_v22 }
 0x2b1   : > { %4598 = vst [vmem:[#allocation72_spill] sm:$0xff] %v3558_v60  ;;  %v3563_v18 = vpop.eup %2428 }
 0x2b2   : > { %v1276_v9 = vrot.slane %v1275_v8, 4  ;;  %v1298_v14 = vadd.f32 %v3549_v61, %v1297_v51  ;;  %v3554_v23 = vpop.f32.mrf.mxu2  ;;  %4599 = vst [vmem:[#allocation73_spill] sm:$0xff] %v3563_v18  ;;  %v3568_v61 = vpop.eup %2430  ;;  %2436 = vpow2.f32 %v1211_v45  ;;  %v1112_v45 = vsub.f32 %v4603_v59, %v3318_v55 }
 0x2b3   : > { %4600 = vst [vmem:[#allocation74_spill] sm:$0xff] %v3568_v61  ;;  %v3573_v50 = vpop.eup %2432 }
 0x2b4   : > { %v1277_v21 = vadd.f32 %v1276_v9, %v1275_v8  ;;  %v1299_v8 = vadd.f32 %v3558_v60, %v1298_v14  ;;  %v1215_v9 = vmul.f32 1.442695, %v1102_v24  ;;  %4601 = vst [vmem:[#allocation75_spill] sm:$0xff] %v3573_v50  ;;  %v1223_v24 = vmul.f32 1.442695, %v1106_v44 }
 0x2b6   : > { %v1278_v25 = vrot.slane %v1277_v21, 2  ;;  %v1300_v51 = vadd.f32 %v3563_v18, %v1299_v8  ;;  %2438 = vpow2.f32 %v1215_v9  ;;  %v1227_v8 = vmul.f32 1.442695, %v1108_v3 }
 0x2b7   : > { %2440 = vpow2.f32 %v1219_v57  ;;  %v4607_v57 = vld [vmem:[#allocation35_spill] sm:$0xff]  ;;  %v1235_v18 = vmul.f32 1.442695, %v1112_v45 }
 0x2b8   : > { %v1279_v0 = vadd.f32 %v1278_v25, %v1277_v21  ;;  %v1301_v17 = vadd.f32 %v3568_v61, %v1300_v51  ;;  %v3580_v22 = vpop.f32.mrf.mxu3  ;;  %v3582_v25 = vpop.eup %2434  ;;  %v1116_v60 = vsub.f32 %v4607_v57, %v3318_v55 }
 0x2b9   : > { %4602 = vst [vmem:[#allocation76_spill] sm:$0xff] %v3582_v25  ;;  %v3587_v27 = vpop.eup %2436 }
 0x2ba   : > { %v1280_v1 = vrot.slane %v1279_v0, 1  ;;  %v1302_v11 = vadd.f32 %v3573_v50, %v1301_v17  ;;  %v3578_v14 = vpop.f32.mrf.mxu2  ;;  %4604 = vst [vmem:[#allocation49_spill] sm:$0xff] %v3587_v27 }
 0x2bc   : > { %v1281_v21 = vadd.f32 %v1280_v1, %v1279_v0  ;;  %v1303_v51 = vadd.f32 %v3582_v25, %v1302_v11  ;;  %v4605_v1 = vld [vmem:[#allocation52_spill] sm:$0xff]  ;;  %v1231_v0 = vmul.f32 1.442695, %v1110_v2  ;;  %v3592_v17 = vpop.eup %2438 }
 0x2bd   : > { %v1114_v44 = vsub.f32 %v4605_v1, %v3318_v55  ;;  %4606 = vst [vmem:[#allocation52_spill] sm:$0xff] %v3592_v17  ;;  %v3596_v59 = vpop.eup %2440  ;;  %v1243_v55 = vmul.f32 1.442695, %v1116_v60 }
 0x2be   : > { %2442 = vrcp.f32 %v1281_v21  ;;  %v1304_v9 = vadd.f32 %v3587_v27, %v1303_v51  ;;  %vm1324_vm2 = vweird.f32 %v1281_v21 }
 0x2bf   : > { %2444 = vpow2.f32 %v1223_v24  ;;  %v1239_v61 = vmul.f32 1.442695, %v1114_v44  ;;  %v1328_v44 = vand.u32 2147483647, %v1281_v21 }
 0x2c0   : > { %2446 = vpow2.f32 %v1227_v8  ;;  %v1305_v3 = vadd.f32 %v3592_v17, %v1304_v9  ;;  %v3601_v24 = vpop.f32.mrf.mxu3  ;;  %v1330_v9 = vand.u32 2147483648, %v1281_v21 }
 0x2c1   : > { %2448 = vpow2.f32 %v1231_v0  ;;  %4608 = vst [vmem:[#allocation35_spill] sm:$0xff] %v3601_v24  ;;  %vm1329_vm4 = vcmp.eq.f32.partialorder %v1328_v44, 8.507059e+37 }
 0x2c2   : > { %v3599_v50 = vpop.f32.mrf.mxu2  ;;  %v1306_v51 = vadd.f32 %v3596_v59, %v1305_v3  ;;  %2450 = vpow2.f32 %v1235_v18 }
 0x2c3   : > { %2452 = vpow2.f32 %v1239_v61 }
 0x2c4   : > { %v2443_v11 = vpop.eup %2442  ;;  %2454 = vpow2.f32 %v1243_v55 }
 0x2c5   : > { %v1320_v2 = vmul.f32 %v2443_v11, %v1281_v21  ;;  %v3604_v1 = vpop.eup %2444  ;;  %vm1325_vm1 = vweird.f32 %v2443_v11 }
 0x2c6   : > { %v1307_v45 = vadd.f32 %v3604_v1, %v1306_v51  ;;  %v3607_v57 = vpop.eup %2446  ;;  %vm1326_vm3 = vmor %vm1324_vm2, %vm1325_vm1 }
 0x2c7   : > { %v1321_v8 = vsub.f32 1.0, %v1320_v2  ;;  %v3610_v27 = vpop.eup %2448  ;;  %v1331_v2 = vor.u32 1.1754944e-38, %v1330_v9 }
 0x2c8   : > { %v1308_v25 = vadd.f32 %v3607_v57, %v1307_v45  ;;  %v3613_v60 = vpop.eup %2450  ;;  %v3617_v17 = vpop.f32.mrf.mxu3 }
 0x2c9   : > { %v1322_v0 = vmul.f32 %v2443_v11, %v1321_v8  ;;  %4609 = vst [vmem:[#allocation77_spill] sm:$0xff] %v3617_v17  ;;  %v3620_v45 = vpop.eup %2452 }
 0x2ca   : > { %v1309_v18 = vadd.f32 %v3610_v27, %v1308_v25  ;;  %v3615_v51 = vpop.f32.mrf.mxu2  ;;  %v3629_v9 = vpop.eup %2454 }
 0x2cb   : > { %v1323_v3 = vadd.f32 %v2443_v11, %v1322_v0 }
 0x2cc   : > { %v1310_v8 = vadd.f32 %v3613_v60, %v1309_v18 }
 0x2cd   : > { %v1327_v61 = vsel %vm1326_vm3, %v2443_v11, %v1323_v3 }
 0x2ce   : > { %v3622_v24 = vsel %vm1329_vm4, %v1331_v2, %v1327_v61  ;;  %v1311_v21 = vadd.f32 %v3620_v45, %v1310_v8 }
 0x2cf   : > { %4610 = vst [vmem:[#allocation78_spill] sm:$0xff] %v3622_v24  ;;  %v1377_v25 = vmul.f32 %v3377_v12, %v3622_v24  ;;  %v1409_v55 = vmul.f32 %v3534_v58, %v3622_v24  ;;  %v1375_v11 = vmul.f32 %v3370_v56, %v3622_v24  ;;  %v1407_v44 = vmul.f32 %v3522_v13, %v3622_v24 }
 0x2d0   : > { %v1312_v0 = vadd.f32 %v3629_v9, %v1311_v21  ;;  %v1373_v12 = vmul.f32 %v3359_v35, %v3622_v24  ;;  %v1405_v58 = vmul.f32 %v3514_v43, %v3622_v24  ;;  %v3642_v61 = vpop.f32.mrf.mxu3  ;;  %v1371_v56 = vmul.f32 %v3352_v29, %v3622_v24 }
 0x2d1   : > { %1843 = vmatpush.msrb.mxu0 %v1377_v25  ;;  %1863 = vmatpush.msrb.mxu1 %v1409_v55  ;;  %4611 = vst [vmem:[#allocation79_spill] sm:$0xff] %v3642_v61  ;;  %v1403_v13 = vmul.f32 %v3506_v38, %v3622_v24  ;;  %v1369_v35 = vmul.f32 %v3345_v48, %v3622_v24 }
 0x2d2   : > { %v1313_v3 = vrot.slane %v1312_v0, 4  ;;  %v3636_v18 = vpop.f32.mrf.mxu2  ;;  %v1401_v43 = vmul.f32 %v3498_v62, %v3622_v24  ;;  %v1367_v25 = vmul.f32 %v3338_v46, %v3622_v24  ;;  %v1399_v29 = vmul.f32 %v3486_v5, %v3622_v24  ;;  %v4613_v46 = vld [vmem:[#allocation25_spill] sm:$0xff] }
 0x2d3   : > { %1844 = vmatpush.msrb.mxu0 %v1375_v11  ;;  %1864 = vmatpush.msrb.mxu1 %v1407_v44  ;;  %v1365_v48 = vmul.f32 %v3327_v28, %v3622_v24  ;;  %v1397_v62 = vmul.f32 %v3478_v7, %v3622_v24  ;;  %v4614_v44 = vld [vmem:[#allocation19_spill] sm:$0xff]  ;;  %v4619_v7 = vld [vmem:[#allocation36_spill] sm:$0xff] }
 0x2d4   : > { %v1314_v2 = vadd.f32 %v1313_v3, %v1312_v0  ;;  %v1411_v5 = vmax.f32 %v4614_v44, %v4613_v46  ;;  %v4615_v3 = vld [vmem:[#allocation29_spill] sm:$0xff]  ;;  %v4623_v44 = vld [vmem:[#allocation47_spill] sm:$0xff] }
 0x2d5   : > { %1845 = vmatpush.msrb.mxu0 %v1373_v12  ;;  %1865 = vmatpush.msrb.mxu1 %v1405_v58  ;;  %v4616_v12 = vld [vmem:[#allocation21_spill] sm:$0xff] }
 0x2d6   : > { %v1315_v8 = vrot.slane %v1314_v2, 2  ;;  %v1412_v58 = vmax.f32 %v4616_v12, %v4615_v3  ;;  %v4624_v3 = vld [vmem:[#allocation50_spill] sm:$0xff] }
 0x2d7   : > { %1846 = vmatpush.msrb.mxu0 %v1371_v56  ;;  %1866 = vmatpush.msrb.mxu1 %v1403_v13  ;;  %v4618_v13 = vld [vmem:[#allocation33_spill] sm:$0xff] }
 0x2d8   : > { %v1316_v21 = vadd.f32 %v1315_v8, %v1314_v2  ;;  %v3662_v11 = vpop.f32.mrf.mxu3  ;;  %v4617_v2 = vld [vmem:[#allocation31_spill] sm:$0xff]  ;;  %v1414_v8 = vmax.f32 %v1412_v58, %v4618_v13 }
 0x2d9   : > { %1847 = vmatpush.msrb.mxu0 %v1369_v35  ;;  %1867 = vmatpush.msrb.mxu1 %v1401_v43  ;;  %4612 = vst [vmem:[#allocation80_spill] sm:$0xff] %v3662_v11  ;;  %v1413_v56 = vmax.f32 %v1411_v5, %v4617_v2  ;;  %v4626_v11 = vld [vmem:[#allocation53_spill] sm:$0xff] }
 0x2da   : > { %v1317_v55 = vrot.slane %v1316_v21, 1  ;;  %v3656_v38 = vpop.f32.mrf.mxu2 }
 0x2db   : > { %1848 = vmatpush.msrb.mxu0 %v1367_v25  ;;  %1868 = vmatpush.msrb.mxu1 %v1399_v29  ;;  %v1415_v43 = vmax.f32 %v1413_v56, %v4619_v7 }
 0x2dc   : > { %v1318_v0 = vadd.f32 %v1317_v55, %v1316_v21  ;;  %v4620_v21 = vld [vmem:[#allocation38_spill] sm:$0xff] }
 0x2dd   : > { %1849 = vmatpush.msrb.mxu0 %v1365_v48  ;;  %1869 = vmatpush.msrb.mxu1 %v1397_v62  ;;  %v1416_v25 = vmax.f32 %v1414_v8, %v4620_v21  ;;  %v4621_v55 = vld [vmem:[#allocation42_spill] sm:$0xff]  ;;  %v4622_v62 = vld [vmem:[#allocation44_spill] sm:$0xff] }
 0x2de   : > { %2456 = vrcp.f32 %v1318_v0  ;;  %v1417_v48 = vmax.f32 %v1415_v43, %v4621_v55  ;;  %v1345_v5 = vand.u32 2147483648, %v1318_v0  ;;  %v1343_v58 = vand.u32 2147483647, %v1318_v0 }
 0x2df   : > { %v1418_v24 = vmax.f32 %v1416_v25, %v4622_v62  ;;  %vm1339_vm6 = vweird.f32 %v1318_v0 }
 0x2e0   : > { %v1419_v61 = vmax.f32 %v1417_v48, %v4623_v44  ;;  %v3678_v13 = vpop.f32.mrf.mxu3  ;;  %vm1344_vm8 = vcmp.eq.f32.partialorder %v1343_v58, 8.507059e+37 }
 0x2e1   : > { %v1420_v12 = vmax.f32 %v1418_v24, %v4624_v3  ;;  %4625 = vst [vmem:[#allocation36_spill] sm:$0xff] %v3678_v13  ;;  %v4628_v3 = vld [vmem:[#allocation22_spill] sm:$0xff] }
 0x2e2   : > { %v3670_v28 = vpop.f32.mrf.mxu2  ;;  %v1421_v56 = vmax.f32 %v1419_v61, %v4626_v11 }
 0x2e3   : > { %v1422_v8 = vmax.f32 %v1420_v12, %v3256_v30 }
 0x2e4   : > { %v2457_v35 = vpop.eup %2456  ;;  %v1423_v25 = vmax.f32 %v1421_v56, %v3272_v31  ;;  %v4630_v56 = vld [vmem:[#allocation20_spill] sm:$0xff] }
 0x2e5   : > { %v1335_v29 = vmul.f32 %v2457_v35, %v1318_v0  ;;  %vm1340_vm5 = vweird.f32 %v2457_v35  ;;  %v1424_v24 = vmax.f32 %v1422_v8, %v3304_v63 }
 0x2e6   : > { %vm1341_vm7 = vmor %vm1339_vm6, %vm1340_vm5  ;;  %v1425_v61 = vmax.f32 %v1423_v25, %v3334_v20 }
 0x2e7   : > { %v1336_v46 = vsub.f32 1.0, %v1335_v29  ;;  %v1346_v29 = vor.u32 1.1754944e-38, %v1345_v5  ;;  %v1426_v12 = vmax.f32 %v1424_v24, %v3366_v39  ;;  %v4629_v5 = vld [vmem:[#allocation26_spill] sm:$0xff]  ;;  %v4632_v24 = vld [vmem:[#allocation32_spill] sm:$0xff] }
 0x2e8   : > { %v1448_v8 = vmax.f32 %v4630_v56, %v4629_v5  ;;  %v1427_v58 = vmax.f32 %v1425_v61, %v3406_v16 }
 0x2e9   : > { %v1337_v2 = vmul.f32 %v2457_v35, %v1336_v46  ;;  %v4627_v46 = vld [vmem:[#allocation30_spill] sm:$0xff] }
 0x2ea   : > { %v3682_v43 = vpop.f32.mrf.mxu2  ;;  %v1449_v44 = vmax.f32 %v4628_v3, %v4627_v46  ;;  %v1429_v5 = vmax.f32 %v1427_v58, %v3490_v19 }
 0x2eb   : > { %v1338_v21 = vadd.f32 %v2457_v35, %v1337_v2 }
 0x2ed   : > { %v1342_v48 = vsel %vm1341_vm7, %v2457_v35, %v1338_v21  ;;  %v4631_v35 = vld [vmem:[#allocation34_spill] sm:$0xff] }
 0x2ee   : > { %v3688_v62 = vsel %vm1344_vm8, %v1346_v29, %v1342_v48  ;;  %v1451_v21 = vmax.f32 %v1449_v44, %v4631_v35  ;;  %v1428_v29 = vmax.f32 %v1426_v12, %v3450_v49  ;;  %v1450_v48 = vmax.f32 %v1448_v8, %v4632_v24  ;;  %v3709_v35 = vpop.f32.mrf.mxu3 }
 0x2ef   : > { %v1378_v0 = vmul.f32 %v3538_v42, %v3688_v62  ;;  %v1410_v2 = vmul.f32 %v3629_v9, %v3688_v62  ;;  %v1376_v25 = vmul.f32 %v3530_v36, %v3688_v62  ;;  %v1408_v42 = vmul.f32 %v3620_v45, %v3688_v62  ;;  %v4633_v9 = vld [vmem:[#allocation39_spill] sm:$0xff]  ;;  %4634 = vst [vmem:[#allocation42_spill] sm:$0xff] %v3709_v35  ;;  %v4635_v45 = vld [vmem:[#allocation37_spill] sm:$0xff] }
 0x2f0   : > { %v1453_v46 = vmax.f32 %v1451_v21, %v4633_v9  ;;  %v1430_v44 = vmax.f32 %v1428_v29, %v3526_v33  ;;  %v1374_v61 = vmul.f32 %v3518_v32, %v3688_v62  ;;  %v1406_v36 = vmul.f32 %v3613_v60, %v3688_v62 }
 0x2f1   : > { %1883 = vmatpush.msrb.mxu2 %v1378_v0  ;;  %1903 = vmatpush.msrb.mxu3 %v1410_v2  ;;  %v1452_v0 = vmax.f32 %v1450_v48, %v4635_v45  ;;  %v4636_v2 = vld [vmem:[#allocation45_spill] sm:$0xff]  ;;  %v1431_v21 = vmax.f32 %v1429_v5, %v3554_v23  ;;  %v1372_v29 = vmul.f32 %v3510_v6, %v3688_v62  ;;  %v4639_v6 = vld [vmem:[#allocation48_spill] sm:$0xff] }
 0x2f2   : > { %v3715_v12 = vpop.f32.mrf.mxu2  ;;  %v1455_v8 = vmax.f32 %v1453_v46, %v4636_v2  ;;  %v1432_v58 = vmax.f32 %v1430_v44, %v3578_v14  ;;  %v1404_v32 = vmul.f32 %v3610_v27, %v3688_v62  ;;  %v1370_v5 = vmul.f32 %v3502_v15, %v3688_v62  ;;  %v4641_v15 = vld [vmem:[#allocation54_spill] sm:$0xff] }
 0x2f3   : > { %1884 = vmatpush.msrb.mxu2 %v1376_v25  ;;  %1904 = vmatpush.msrb.mxu3 %v1408_v42  ;;  %v4637_v25 = vld [vmem:[#allocation43_spill] sm:$0xff]  ;;  %v1433_v48 = vmax.f32 %v1431_v21, %v3599_v50  ;;  %v1402_v44 = vmul.f32 %v3607_v57, %v3688_v62  ;;  %v1368_v21 = vmul.f32 %v3494_v41, %v3688_v62 }
 0x2f4   : > { %v1454_v60 = vmax.f32 %v1452_v0, %v4637_v25  ;;  %v4638_v42 = vld [vmem:[#allocation51_spill] sm:$0xff]  ;;  %v1434_v46 = vmax.f32 %v1432_v58, %v3615_v51  ;;  %v1400_v58 = vmul.f32 %v3604_v1, %v3688_v62 }
 0x2f5   : > { %1885 = vmatpush.msrb.mxu2 %v1374_v61  ;;  %1905 = vmatpush.msrb.mxu3 %v1406_v36  ;;  %v1457_v9 = vmax.f32 %v1455_v8, %v4638_v42  ;;  %v4640_v36 = vld [vmem:[#allocation40_spill] sm:$0xff]  ;;  %v1435_v0 = vmax.f32 %v1433_v48, %v3636_v18  ;;  %v1398_v48 = vmul.f32 %v3596_v59, %v3688_v62 }
 0x2f6   : > { %v1456_v61 = vmax.f32 %v1454_v60, %v4639_v6  ;;  %v1436_v8 = vmax.f32 %v1434_v46, %v3656_v38  ;;  %v1366_v60 = vmul.f32 %v3482_v10, %v3688_v62 }
 0x2f7   : > { %1886 = vmatpush.msrb.mxu2 %v1372_v29  ;;  %1906 = vmatpush.msrb.mxu3 %v1404_v32  ;;  %v1459_v27 = vmax.f32 %v1457_v9, %v4640_v36  ;;  %v1437_v32 = vmax.f32 %v1435_v0, %v3670_v28 }
 0x2f8   : > { %v1458_v29 = vmax.f32 %v1456_v61, %v4641_v15  ;;  %v1438_v9 = vmax.f32 %v1436_v8, %v3682_v43  ;;  %v3755_v61 = vpop.f32.mrf.mxu3 }
 0x2f9   : > { %1887 = vmatpush.msrb.mxu2 %v1370_v5  ;;  %1907 = vmatpush.msrb.mxu3 %v1402_v44  ;;  %v1461_v57 = vmax.f32 %v1459_v27, %v3306_v4  ;;  %v1439_v5 = vmax.f32 %v1437_v32, %v3715_v12  ;;  %4642 = vst [vmem:[#allocation53_spill] sm:$0xff] %v3755_v61 }
 0x2fa   : > { %v3749_v41 = vpop.f32.mrf.mxu2  ;;  %v1460_v1 = vmax.f32 %v1458_v29, %v3274_v34 }
 0x2fb   : > { %1888 = vmatpush.msrb.mxu2 %v1368_v21  ;;  %1908 = vmatpush.msrb.mxu3 %v1400_v58  ;;  %v1463_v46 = vmax.f32 %v1461_v57, %v3368_v54  ;;  %v1440_v44 = vmax.f32 %v1438_v9, %v3749_v41  ;;  %v4644_v54 = vld [vmem:[#allocation80_spill] sm:$0xff] }
 0x2fc   : > { %v1462_v27 = vmax.f32 %v1460_v1, %v3336_v40 }
 0x2fd   : > { %1889 = vmatpush.msrb.mxu2 %v1366_v60  ;;  %1909 = vmatpush.msrb.mxu3 %v1398_v48  ;;  %v1465_v10 = vmax.f32 %v1463_v46, %v3452_v47  ;;  %v1441_v0 = vmax.f32 %v1439_v5, %v1440_v44  ;;  %v4643_v48 = vld [vmem:[#allocation35_spill] sm:$0xff] }
 0x2fe   : > { %v1464_v59 = vmax.f32 %v1462_v27, %v3408_v37  ;;  %v4646_v27 = vld [vmem:[#allocation79_spill] sm:$0xff] }
 0x2ff   : > { %v1467_v8 = vmax.f32 %v1465_v10, %v3528_v26  ;;  %v1442_v21 = vrot.slane %v1441_v0, 4 }
 0x300   : > { %v1466_v58 = vmax.f32 %v1464_v59, %v3492_v52  ;;  %v3767_v44 = vpop.f32.mrf.mxu3 }
 0x301   : > { %v1469_v29 = vmax.f32 %v1467_v8, %v3580_v22  ;;  %v1443_v57 = vmax.f32 %v1441_v0, %v1442_v21  ;;  %4645 = vst [vmem:[#allocation22_spill] sm:$0xff] %v3767_v44 }
 0x302   : > { %v1468_v32 = vmax.f32 %v1466_v58, %v3556_v53 }
 0x303   : > { %v1471_v9 = vmax.f32 %v1469_v29, %v3617_v17  ;;  %v1444_v60 = vrot.slane %v1443_v57, 2 }
 0x304   : > { %v1470_v1 = vmax.f32 %v1468_v32, %v4643_v48  ;;  %v4647_v32 = vld [vmem:[#allocation19_spill] sm:$0xff] }
 0x305   : > { %v1473_v46 = vmax.f32 %v1471_v9, %v4644_v54  ;;  %v1445_v5 = vmax.f32 %v1443_v57, %v1444_v60  ;;  %v4648_v57 = vld [vmem:[#allocation21_spill] sm:$0xff] }
 0x306   : > { %v1472_v10 = vmax.f32 %v1470_v1, %v4646_v27  ;;  %v4649_v1 = vld [vmem:[#allocation25_spill] sm:$0xff] }
 0x307   : > { %v1475_v26 = vmax.f32 %v1473_v46, %v3709_v35  ;;  %v1446_v59 = vrot.slane %v1445_v5, 1  ;;  %v4650_v35 = vld [vmem:[#allocation29_spill] sm:$0xff] }
 0x308   : > { %v1474_v8 = vmax.f32 %v1472_v10, %v3678_v13 }
 0x309   : > { %v1477_v0 = vmax.f32 %v1475_v26, %v3767_v44  ;;  %v3774_v58 = vmax.f32 %v1445_v5, %v1446_v59  ;;  %v4651_v44 = vld [vmem:[#allocation78_spill] sm:$0xff]  ;;  %v4653_v59 = vld [vmem:[#allocation31_spill] sm:$0xff] }
 0x30a   : > { %v1476_v21 = vmax.f32 %v1474_v8, %v3755_v61  ;;  %v4652_v8 = vld [vmem:[#allocation59_spill] sm:$0xff] }
 0x30b   : > { %v1485_v9 = vsub.f32 %v4647_v32, %v3774_v58  ;;  %v1487_v60 = vsub.f32 %v4648_v57, %v3774_v58  ;;  %v1489_v54 = vsub.f32 %v4649_v1, %v3774_v58  ;;  %v1491_v10 = vsub.f32 %v4650_v35, %v3774_v58  ;;  %v4654_v32 = vld [vmem:[#allocation69_spill] sm:$0xff] }
 0x30c   : > { %v1478_v29 = vmax.f32 %v1476_v21, %v1477_v0  ;;  %v1363_v5 = vmul.f32 %v4652_v8, %v4651_v44  ;;  %v1493_v0 = vsub.f32 %v4653_v59, %v3774_v58  ;;  %v1395_v61 = vmul.f32 %v4654_v32, %v4651_v44  ;;  %v4655_v1 = vld [vmem:[#allocation33_spill] sm:$0xff] }
 0x30d   : > { %v1549_v13 = vmul.f32 1.442695, %v1485_v9  ;;  %v1553_v26 = vmul.f32 1.442695, %v1487_v60  ;;  %v1557_v21 = vmul.f32 1.442695, %v1489_v54  ;;  %v1495_v27 = vsub.f32 %v4655_v1, %v3774_v58 }
 0x30e   : > { %v1479_v46 = vrot.slane %v1478_v29, 4  ;;  %1850 = vmatpush.msrb.mxu0 %v1363_v5  ;;  %v1561_v35 = vmul.f32 1.442695, %v1491_v10  ;;  %1870 = vmatpush.msrb.mxu1 %v1395_v61  ;;  %v1497_v9 = vsub.f32 %v4619_v7, %v3774_v58  ;;  %v1565_v60 = vmul.f32 1.442695, %v1493_v0  ;;  %v4656_v54 = vld [vmem:[#allocation38_spill] sm:$0xff] }
 0x30f   : > { %2458 = vpow2.f32 %v1549_v13  ;;  %v1499_v59 = vsub.f32 %v4656_v54, %v3774_v58  ;;  %v1569_v32 = vmul.f32 1.442695, %v1495_v27  ;;  %v4659_v10 = vld [vmem:[#allocation44_spill] sm:$0xff] }
 0x310   : > { %v1480_v57 = vmax.f32 %v1478_v29, %v1479_v46  ;;  %2460 = vpow2.f32 %v1553_v26  ;;  %v1501_v46 = vsub.f32 %v4621_v55, %v3774_v58  ;;  %v1573_v61 = vmul.f32 1.442695, %v1497_v9  ;;  %v4660_v26 = vld [vmem:[#allocation47_spill] sm:$0xff]  ;;  %v4663_v55 = vld [vmem:[#allocation52_spill] sm:$0xff] }
 0x311   : > { %2462 = vpow2.f32 %v1557_v21  ;;  %v1503_v7 = vsub.f32 %v4659_v10, %v3774_v58  ;;  %v1505_v5 = vsub.f32 %v4660_v26, %v3774_v58  ;;  %v1577_v1 = vmul.f32 1.442695, %v1499_v59  ;;  %v4665_v26 = vld [vmem:[#allocation58_spill] sm:$0xff] }
 0x312   : > { %v1481_v8 = vrot.slane %v1480_v57, 2  ;;  %2464 = vpow2.f32 %v1561_v35  ;;  %v4662_v35 = vld [vmem:[#allocation70_spill] sm:$0xff]  ;;  %v1396_v9 = vmul.f32 %v4663_v55, %v3688_v62  ;;  %v1361_v48 = vmul.f32 %v4665_v26, %v4651_v44  ;;  %v4668_v55 = vld [vmem:[#allocation49_spill] sm:$0xff] }
 0x313   : > { %2466 = vpow2.f32 %v1565_v60  ;;  %v1364_v54 = vmul.f32 %v4662_v35, %v3688_v62  ;;  %v4664_v60 = vld [vmem:[#allocation50_spill] sm:$0xff]  ;;  %v1581_v59 = vmul.f32 1.442695, %v1501_v46  ;;  %v4669_v26 = vld [vmem:[#allocation57_spill] sm:$0xff]  ;;  %v1509_v46 = vsub.f32 %v4626_v11, %v3774_v58 }
 0x314   : > { %v1482_v21 = vmax.f32 %v1480_v57, %v1481_v8  ;;  %2468 = vpow2.f32 %v1569_v32  ;;  %v1507_v10 = vsub.f32 %v4664_v60, %v3774_v58  ;;  %v4666_v57 = vld [vmem:[#allocation67_spill] sm:$0xff]  ;;  %1910 = vmatpush.msrb.mxu3 %v1396_v9  ;;  %v4667_v32 = vld [vmem:[#allocation68_spill] sm:$0xff]  ;;  %v1394_v60 = vmul.f32 %v4668_v55, %v3688_v62  ;;  %1851 = vmatpush.msrb.mxu0 %v1361_v48 }
 0x315   : > { %v3796_v13 = vpop.eup %2458  ;;  %v1393_v8 = vmul.f32 %v4666_v57, %v4651_v44  ;;  %2470 = vpow2.f32 %v1573_v61  ;;  %1890 = vmatpush.msrb.mxu2 %v1364_v54  ;;  %v1362_v35 = vmul.f32 %v4667_v32, %v3688_v62  ;;  %v4670_v57 = vld [vmem:[#allocation46_spill] sm:$0xff]  ;;  %v1585_v54 = vmul.f32 1.442695, %v1503_v7 }
 0x316   : > { %4657 = vst [vmem:[#allocation20_spill] sm:$0xff] %v3796_v13  ;;  %v3798_v29 = vpop.eup %2460  ;;  %2472 = vpow2.f32 %v1577_v1  ;;  %1911 = vmatpush.msrb.mxu3 %v1394_v60  ;;  %v1589_v32 = vmul.f32 1.442695, %v1505_v5  ;;  %v1515_v11 = vsub.f32 %v3304_v63, %v3774_v58  ;;  %v1593_v7 = vmul.f32 1.442695, %v1507_v10 }
 0x317   : > { %4658 = vst [vmem:[#allocation32_spill] sm:$0xff] %v3798_v29  ;;  %v1677_v0 = vadd.f32 %v3798_v29, %v3796_v13  ;;  %v3808_v27 = vpop.eup %2462  ;;  %1871 = vmatpush.msrb.mxu1 %v1393_v8  ;;  %v1359_v29 = vmul.f32 %v4669_v26, %v4651_v44  ;;  %1891 = vmatpush.msrb.mxu2 %v1362_v35  ;;  %2474 = vpow2.f32 %v1581_v59  ;;  %v1483_v35 = vrot.slane %v1482_v21, 1 }
 0x318   : > { %4661 = vst [vmem:[#allocation37_spill] sm:$0xff] %v3808_v27  ;;  %v3821_v13 = vpop.eup %2464  ;;  %v1513_v8 = vsub.f32 %v3272_v31, %v3774_v58  ;;  %2476 = vpow2.f32 %v1585_v54  ;;  %v1521_v31 = vsub.f32 %v3406_v16, %v3774_v58  ;;  %v1523_v63 = vsub.f32 %v3450_v49, %v3774_v58 }
 0x319   : > { %v1678_v17 = vadd.f32 %v3808_v27, %v1677_v0  ;;  %v1391_v27 = vmul.f32 %v4670_v57, %v4651_v44  ;;  %v3832_v61 = vpop.eup %2466  ;;  %1852 = vmatpush.msrb.mxu0 %v1359_v29  ;;  %v1519_v29 = vsub.f32 %v3366_v39, %v3774_v58  ;;  %v1525_v60 = vsub.f32 %v3490_v19, %v3774_v58 }
 0x31a   : > { %v3839_v9 = vpop.eup %2468  ;;  %2478 = vpow2.f32 %v1589_v32  ;;  %v1605_v39 = vmul.f32 1.442695, %v1513_v8  ;;  %v3864_v26 = vmax.f32 %v1482_v21, %v1483_v35  ;;  %v1529_v57 = vsub.f32 %v3554_v23, %v3774_v58 }
 0x31b   : > { %v1679_v0 = vadd.f32 %v3821_v13, %v1678_v17  ;;  %v1511_v17 = vsub.f32 %v3256_v30, %v3774_v58  ;;  %1872 = vmatpush.msrb.mxu1 %v1391_v27  ;;  %v3846_v55 = vpop.eup %2470  ;;  %v1517_v30 = vsub.f32 %v3334_v20, %v3774_v58  ;;  %v1597_v27 = vmul.f32 1.442695, %v1509_v46 }
 0x31c   : > { %v3857_v59 = vpop.eup %2472  ;;  %v1527_v20 = vsub.f32 %v3526_v33, %v3774_v58  ;;  %2480 = vpow2.f32 %v1593_v7  ;;  %v1531_v46 = vsub.f32 %v3578_v14, %v3774_v58  ;;  %v1533_v33 = vsub.f32 %v3599_v50, %v3774_v58 }
 0x31d   : > { %v1680_v48 = vadd.f32 %v3832_v61, %v1679_v0  ;;  %v1601_v5 = vmul.f32 1.442695, %v1511_v17  ;;  %v1609_v0 = vmul.f32 1.442695, %v1515_v11  ;;  %v3866_v49 = vpop.eup %2474  ;;  %2482 = vpow2.f32 %v1597_v27 }
 0x31e   : > { %v1613_v19 = vmul.f32 1.442695, %v1517_v30  ;;  %v1617_v54 = vmul.f32 1.442695, %v1519_v29  ;;  %v1535_v21 = vsub.f32 %v3615_v51, %v3774_v58  ;;  %v1537_v23 = vsub.f32 %v3636_v18, %v3774_v58 }
 0x31f   : > { %v1681_v1 = vadd.f32 %v3839_v9, %v1680_v48  ;;  %2484 = vpow2.f32 %v1601_v5  ;;  %v3875_v48 = vpop.eup %2476  ;;  %v1621_v8 = vmul.f32 1.442695, %v1521_v31  ;;  %v1625_v14 = vmul.f32 1.442695, %v1523_v63  ;;  %v4671_v31 = vld [vmem:[#allocation26_spill] sm:$0xff]  ;;  %v4680_v5 = vld [vmem:[#allocation76_spill] sm:$0xff] }
 0x320   : > { %2486 = vpow2.f32 %v1605_v39  ;;  %v1486_v50 = vsub.f32 %v4630_v56, %v3864_v26  ;;  %v3884_v11 = vpop.eup %2478  ;;  %v1539_v7 = vsub.f32 %v3656_v38, %v3774_v58  ;;  %v1488_v51 = vsub.f32 %v4628_v3, %v3864_v26  ;;  %v4672_v39 = vld [vmem:[#allocation30_spill] sm:$0xff] }
 0x321   : > { %v1682_v10 = vadd.f32 %v3846_v55, %v1681_v1  ;;  %2488 = vpow2.f32 %v1609_v0  ;;  %v1629_v1 = vmul.f32 1.442695, %v1525_v60  ;;  %v1541_v35 = vsub.f32 %v3670_v28, %v3774_v58 }
 0x322   : > { %2490 = vpow2.f32 %v1613_v19  ;;  %v3890_v18 = vpop.eup %2480  ;;  %v1633_v30 = vmul.f32 1.442695, %v1527_v20  ;;  %v1637_v38 = vmul.f32 1.442695, %v1529_v57  ;;  %v1490_v63 = vsub.f32 %v4671_v31, %v3864_v26 }
 0x323   : > { %v1683_v16 = vadd.f32 %v3857_v59, %v1682_v10  ;;  %2492 = vpow2.f32 %v1617_v54  ;;  %v3895_v56 = vpop.eup %2482  ;;  %v1551_v10 = vmul.f32 1.442695, %v1486_v50  ;;  %v1492_v0 = vsub.f32 %v4672_v39, %v3864_v26 }
 0x324   : > { %2494 = vpow2.f32 %v1621_v8  ;;  %v1641_v19 = vmul.f32 1.442695, %v1531_v46  ;;  %v1645_v54 = vmul.f32 1.442695, %v1533_v33  ;;  %v1559_v50 = vmul.f32 1.442695, %v1490_v63 }
 0x325   : > { %v1684_v17 = vadd.f32 %v3866_v49, %v1683_v16  ;;  %v3901_v3 = vpop.eup %2484  ;;  %2496 = vpow2.f32 %v1625_v14  ;;  %v1555_v16 = vmul.f32 1.442695, %v1488_v51  ;;  %v1649_v14 = vmul.f32 1.442695, %v1535_v21  ;;  %v4676_v63 = vld [vmem:[#allocation39_spill] sm:$0xff] }
 0x326   : > { %v3906_v60 = vpop.eup %2486  ;;  %2498 = vpow2.f32 %v1629_v1  ;;  %v3923_v51 = vmul.f32 1.442695, %v1539_v7  ;;  %v3928_v33 = vmul.f32 1.442695, %v1541_v35  ;;  %v1563_v31 = vmul.f32 1.442695, %v1492_v0 }
 0x327   : > { %v1685_v32 = vadd.f32 %v3875_v48, %v1684_v17  ;;  %v3912_v57 = vpop.eup %2488  ;;  %2500 = vpow2.f32 %v1633_v30  ;;  %v1498_v7 = vsub.f32 %v4635_v45, %v3864_v26  ;;  %v1502_v35 = vsub.f32 %v4637_v25, %v3864_v26 }
 0x328   : > { %v3915_v8 = vpop.eup %2490  ;;  %2502 = vpow2.f32 %v1637_v38  ;;  %v4675_v38 = vld [vmem:[#allocation34_spill] sm:$0xff]  ;;  %v1504_v39 = vsub.f32 %v4636_v2, %v3864_v26  ;;  %v1506_v45 = vsub.f32 %v4639_v6, %v3864_v26  ;;  %v1392_v27 = vmul.f32 %v4680_v5, %v3688_v62  ;;  %v4681_v2 = vld [vmem:[#allocation56_spill] sm:$0xff]  ;;  %v4685_v5 = vld [vmem:[#allocation75_spill] sm:$0xff] }
 0x329   : > { %v1686_v29 = vadd.f32 %v3884_v11, %v1685_v32  ;;  %4673 = vst [vmem:[#allocation45_spill] sm:$0xff] %v3915_v8  ;;  %v1494_v32 = vsub.f32 %v4632_v24, %v3864_v26  ;;  %v3919_v1 = vpop.eup %2492  ;;  %2504 = vpow2.f32 %v1551_v10  ;;  %v1496_v21 = vsub.f32 %v4675_v38, %v3864_v26  ;;  %v4678_v6 = vld [vmem:[#allocation66_spill] sm:$0xff] }
 0x32a   : > { %4674 = vst [vmem:[#allocation43_spill] sm:$0xff] %v3919_v1  ;;  %v3926_v46 = vpop.eup %2494  ;;  %2506 = vpow2.f32 %v1555_v16  ;;  %v1575_v38 = vmul.f32 1.442695, %v1498_v7  ;;  %1912 = vmatpush.msrb.mxu3 %v1392_v27  ;;  %v4688_v27 = vld [vmem:[#allocation64_spill] sm:$0xff] }
 0x32b   : > { %v1687_v28 = vadd.f32 %v3890_v18, %v1686_v29  ;;  %v3921_v29 = vmul.f32 1.442695, %v1537_v23  ;;  %v3932_v24 = vpop.eup %2496  ;;  %2508 = vpow2.f32 %v1641_v19  ;;  %v1567_v0 = vmul.f32 1.442695, %v1494_v32 }
 0x32c   : > { %v3939_v10 = vpop.eup %2498  ;;  %2510 = vpow2.f32 %v1559_v50  ;;  %v1571_v32 = vmul.f32 1.442695, %v1496_v21 }
 0x32d   : > { %v1688_v17 = vadd.f32 %v3895_v56, %v1687_v28  ;;  %v1500_v28 = vsub.f32 %v4676_v63, %v3864_v26  ;;  %v3945_v16 = vpop.eup %2500  ;;  %2512 = vpow2.f32 %v1645_v54 }
 0x32e   : > { %2514 = vpow2.f32 %v1563_v31  ;;  %v1357_v31 = vmul.f32 %v4681_v2, %v4651_v44  ;;  %v1390_v2 = vmul.f32 %v4685_v5, %v3688_v62  ;;  %v4690_v5 = vld [vmem:[#allocation74_spill] sm:$0xff] }
 0x32f   : > { %v1689_v30 = vadd.f32 %v3901_v3, %v1688_v17  ;;  %2516 = vpow2.f32 %v1649_v14  ;;  %v1579_v20 = vmul.f32 1.442695, %v1500_v28 }
 0x330   : > { %2518 = vpow2.f32 %v1567_v0  ;;  %v4683_v0 = vld [vmem:[#allocation65_spill] sm:$0xff]  ;;  %1853 = vmatpush.msrb.mxu0 %v1357_v31  ;;  %1913 = vmatpush.msrb.mxu3 %v1390_v2 }
 0x331   : > { %v1690_v23 = vadd.f32 %v3906_v60, %v1689_v30  ;;  %v3952_v30 = vpop.eup %2502  ;;  %v1358_v28 = vmul.f32 %v4683_v0, %v3688_v62  ;;  %2520 = vpow2.f32 %v1571_v32  ;;  %v1356_v32 = vmul.f32 %v4688_v27, %v3688_v62 }
 0x332   : > { %v3958_v50 = vpop.eup %2504  ;;  %2522 = vpow2.f32 %v1575_v38 }
 0x333   : > { %v1691_v19 = vadd.f32 %v3912_v57, %v1690_v23  ;;  %4677 = vst [vmem:[#allocation51_spill] sm:$0xff] %v3958_v50  ;;  %v1360_v23 = vmul.f32 %v4678_v6, %v3688_v62  ;;  %v3963_v63 = vpop.eup %2506  ;;  %2524 = vpow2.f32 %v1579_v20  ;;  %v4698_v20 = vld [vmem:[#allocation61_spill] sm:$0xff] }
 0x334   : > { %4679 = vst [vmem:[#allocation48_spill] sm:$0xff] %v3963_v63  ;;  %v3969_v21 = vpop.eup %2508  ;;  %v1714_v7 = vadd.f32 %v3963_v63, %v3958_v50  ;;  %v4687_v50 = vld [vmem:[#allocation41_spill] sm:$0xff] }
 0x335   : > { %v1692_v54 = vadd.f32 %v3915_v8, %v1691_v19  ;;  %1892 = vmatpush.msrb.mxu2 %v1360_v23  ;;  %v4682_v19 = vld [vmem:[#allocation16_spill] sm:$0xff]  ;;  %v3978_v25 = vpop.eup %2510  ;;  %v1387_v23 = vmul.f32 %v4687_v50, %v4651_v44  ;;  %v1583_v8 = vmul.f32 1.442695, %v1502_v35  ;;  %v1388_v50 = vmul.f32 %v4690_v5, %v3688_v62  ;;  %v4692_v35 = vld [vmem:[#allocation62_spill] sm:$0xff]  ;;  %v4695_v5 = vld [vmem:[#allocation73_spill] sm:$0xff] }
 0x336   : > { %v1389_v6 = vmul.f32 %v4682_v19, %v4651_v44  ;;  %4684 = vst [vmem:[#allocation40_spill] sm:$0xff] %v3978_v25  ;;  %v3986_v63 = vpop.eup %2512  ;;  %v1715_v0 = vadd.f32 %v3978_v25, %v1714_v7 }
 0x337   : > { %v1693_v14 = vadd.f32 %v3919_v1, %v1692_v54  ;;  %v4686_v54 = vld [vmem:[#allocation55_spill] sm:$0xff]  ;;  %1893 = vmatpush.msrb.mxu2 %v1358_v28  ;;  %v3992_v31 = vpop.eup %2514  ;;  %v1587_v28 = vmul.f32 1.442695, %v1504_v39  ;;  %1914 = vmatpush.msrb.mxu3 %v1388_v50  ;;  %v4697_v39 = vld [vmem:[#allocation60_spill] sm:$0xff]  ;;  %v1352_v50 = vmul.f32 %v4698_v20, %v3688_v62  ;;  %2526 = vpow2.f32 %v1583_v8 }
 0x338   : > { %v1355_v17 = vmul.f32 %v4686_v54, %v4651_v44  ;;  %1873 = vmatpush.msrb.mxu1 %v1389_v6  ;;  %4689 = vst [vmem:[#allocation54_spill] sm:$0xff] %v3992_v31  ;;  %v4691_v54 = vld [vmem:[#allocation15_spill] sm:$0xff]  ;;  %v4000_v7 = vpop.eup %2516  ;;  %v1716_v27 = vadd.f32 %v3992_v31, %v1715_v0  ;;  %v1591_v0 = vmul.f32 1.442695, %v1506_v45  ;;  %v4701_v45 = vld [vmem:[#allocation13_spill] sm:$0xff] }
 0x339   : > { %v1694_v19 = vadd.f32 %v3926_v46, %v1693_v14  ;;  %v1353_v1 = vmul.f32 %v4691_v54, %v4651_v44  ;;  %v1385_v14 = vmul.f32 %v4692_v35, %v4651_v44  ;;  %1894 = vmatpush.msrb.mxu2 %v1356_v32  ;;  %v4006_v2 = vpop.eup %2518  ;;  %v1386_v54 = vmul.f32 %v4695_v5, %v3688_v62  ;;  %v4696_v35 = vld [vmem:[#allocation14_spill] sm:$0xff]  ;;  %v4703_v8 = vld [vmem:[#allocation27_spill] sm:$0xff] }
 0x33a   : > { %1854 = vmatpush.msrb.mxu0 %v1355_v17  ;;  %1874 = vmatpush.msrb.mxu1 %v1387_v23  ;;  %v4693_v17 = vld [vmem:[#allocation63_spill] sm:$0xff]  ;;  %4694 = vst [vmem:[#allocation19_spill] sm:$0xff] %v4006_v2  ;;  %v1351_v25 = vmul.f32 %v4696_v35, %v4651_v44  ;;  %v1717_v32 = vadd.f32 %v4006_v2, %v1716_v27  ;;  %v4700_v35 = vld [vmem:[#allocation12_spill] sm:$0xff]  ;;  %2528 = vpow2.f32 %v1587_v28 }
 0x33b   : > { %v1695_v6 = vadd.f32 %v3932_v24, %v1694_v19  ;;  %v1354_v38 = vmul.f32 %v4693_v17, %v3688_v62  ;;  %v1383_v19 = vmul.f32 %v4697_v39, %v4651_v44  ;;  %1915 = vmatpush.msrb.mxu3 %v1386_v54  ;;  %v4699_v17 = vld [vmem:[#allocation72_spill] sm:$0xff]  ;;  %v1349_v39 = vmul.f32 %v4700_v35, %v4651_v44 }
 0x33c   : > { %1855 = vmatpush.msrb.mxu0 %v1353_v1  ;;  %1875 = vmatpush.msrb.mxu1 %v1385_v14  ;;  %v4018_v1 = vpop.eup %2520  ;;  %v1384_v5 = vmul.f32 %v4699_v17, %v3688_v62  ;;  %v4702_v27 = vsub.f32 %v4638_v42, %v3864_v26  ;;  %v4704_v17 = vld [vmem:[#allocation71_spill] sm:$0xff]  ;;  %2530 = vpow2.f32 %v3921_v29  ;;  %v4707_v28 = vld [vmem:[#allocation24_spill] sm:$0xff] }
 0x33d   : > { %v1696_v23 = vadd.f32 %v3939_v10, %v1695_v6  ;;  %1895 = vmatpush.msrb.mxu2 %v1354_v38  ;;  %v1381_v6 = vmul.f32 %v4701_v45, %v4651_v44  ;;  %v1718_v20 = vadd.f32 %v4018_v1, %v1717_v32  ;;  %v4033_v54 = vpop.eup %2522  ;;  %v1382_v35 = vmul.f32 %v4704_v17, %v3688_v62  ;;  %v4706_v42 = vld [vmem:[#allocation23_spill] sm:$0xff] }
 0x33e   : > { %1856 = vmatpush.msrb.mxu0 %v1351_v25  ;;  %v1595_v38 = vmul.f32 1.442695, %v4702_v27  ;;  %1876 = vmatpush.msrb.mxu1 %v1383_v19  ;;  %v1350_v25 = vmul.f32 %v4703_v8, %v3688_v62  ;;  %v1379_v27 = vmul.f32 %v4706_v42, %v4651_v44  ;;  %2532 = vpow2.f32 %v1591_v0 }
 0x33f   : > { %v1697_v14 = vadd.f32 %v3945_v16, %v1696_v23  ;;  %1896 = vmatpush.msrb.mxu2 %v1352_v50  ;;  %1916 = vmatpush.msrb.mxu3 %v1384_v5  ;;  %v4705_v23 = vld [vmem:[#allocation11_spill] sm:$0xff]  ;;  %v1719_v32 = vadd.f32 %v4033_v54, %v1718_v20  ;;  %v1348_v50 = vmul.f32 %v4707_v28, %v3688_v62  ;;  %v4046_v5 = vpop.eup %2524  ;;  %2534 = vpow2.f32 %v3923_v51 }
 0x340   : > { %1857 = vmatpush.msrb.mxu0 %v1349_v39  ;;  %v1333_v45 = vmul.f32 %v4705_v23, %v4651_v44  ;;  %1877 = vmatpush.msrb.mxu1 %v1381_v6  ;;  %v1514_v39 = vsub.f32 %v3274_v34, %v3864_v26  ;;  %v4708_v44 = vsub.f32 %v4641_v15, %v3864_v26  ;;  %v4061_v15 = vpop.eup %2526  ;;  %2536 = vpow2.f32 %v1595_v38  ;;  %v4079_v38 = vld [vmem:[%s2868_s26 + $0x8] sm:$0xff] }
 0x341   : > { %v1698_v19 = vadd.f32 %v3952_v30, %v1697_v14  ;;  %1897 = vmatpush.msrb.mxu2 %v1350_v25  ;;  %1917 = vmatpush.msrb.mxu3 %v1382_v35  ;;  %v4709_v14 = vld [vmem:[#allocation28_spill] sm:$0xff]  ;;  %v4710_v20 = vsub.f32 %v3682_v43, %v3774_v58  ;;  %v1720_v0 = vadd.f32 %v4046_v5, %v1719_v32  ;;  %v4069_v43 = vld [vmem:[%s2868_s26] sm:$0xff]  ;;  %2538 = vpow2.f32 %v3928_v33 }
 0x342   : > { %v1599_v29 = vmul.f32 1.442695, %v4708_v44  ;;  %1858 = vmatpush.msrb.mxu0 %v1333_v45  ;;  %v1380_v6 = vmul.f32 %v4709_v14, %v3688_v62  ;;  %1878 = vmatpush.msrb.mxu1 %v1379_v27  ;;  %v1516_v25 = vsub.f32 %v3306_v4, %v3864_v26  ;;  %v4711_v62 = vsub.f32 %v4640_v36, %v3864_v26  ;;  %v4083_v36 = vpop.eup %2528 }
 0x343   : > { %v1665_v8 = vmul.f32 1.442695, %v4710_v20  ;;  %v1699_v34 = vadd.f32 %v3969_v21, %v1698_v19  ;;  %1898 = vmatpush.msrb.mxu2 %v1348_v50  ;;  %4712 = vst [vmem:[#allocation21_spill] sm:$0xff] %v4069_v43  ;;  %v4713_v17 = vsub.f32 %v3715_v12, %v3774_v58  ;;  %v1721_v4 = vadd.f32 %v4061_v15, %v1720_v0  ;;  %v4088_v12 = vpop.eup %2530  ;;  %v4716_v50 = vld [vmem:[#allocation17_spill] sm:$0xff] }
 0x344   : > { %v1603_v51 = vmul.f32 1.442695, %v4711_v62  ;;  %1918 = vmatpush.msrb.mxu3 %v1380_v6  ;;  %1899 = vmatmul.f32.vlgmr.msrb.gmra.mxu2 %v4069_v43  ;;  %4714 = vst [vmem:[#allocation25_spill] sm:$0xff] %v4079_v38  ;;  %v1518_v45 = vsub.f32 %v3336_v40, %v3864_v26  ;;  %2540 = vpow2.f32 %v1599_v29  ;;  %v1607_v33 = vmul.f32 1.442695, %v1514_v39  ;;  %v4095_v28 = vpop.eup %2532 }
 0x345   : > { %v1669_v35 = vmul.f32 1.442695, %v4713_v17  ;;  %v1700_v23 = vadd.f32 %v3986_v63, %v1699_v34  ;;  %1919 = vmatmul.f32.vlgmr.msrb.gmra.mxu3 %v4079_v38  ;;  %1859 = vmatmul.f32.vlgmr.msrb.gmra.mxu0 %v4069_v43  ;;  %2542 = vpow2.f32 %v1665_v8  ;;  %v4715_v42 = vsub.f32 %v3749_v41, %v3774_v58  ;;  %v4099_v44 = vpop.eup %2534 }
 0x346   : > { %1879 = vmatmul.f32.vlgmr.msrb.gmra.mxu1 %v4079_v38  ;;  %v1722_v32 = vadd.f32 %v4083_v36, %v1721_v4  ;;  %v1520_v40 = vsub.f32 %v4716_v50, %v3864_v26  ;;  %2544 = vpow2.f32 %v1603_v51  ;;  %v1611_v39 = vmul.f32 1.442695, %v1516_v25  ;;  %v4103_v41 = vpop.eup %2536 }
 0x347   : > { %v1673_v27 = vmul.f32 1.442695, %v4715_v42  ;;  %v1701_v19 = vadd.f32 %v4000_v7, %v1700_v23  ;;  %2546 = vpow2.f32 %v1669_v35  ;;  %v1522_v58 = vsub.f32 %v3408_v37, %v3864_v26  ;;  %v4107_v20 = vpop.eup %2538 }
 0x348   : > { %v1723_v14 = vadd.f32 %v4095_v28, %v1722_v32  ;;  %2548 = vpow2.f32 %v1607_v33  ;;  %v1615_v6 = vmul.f32 1.442695, %v1518_v45  ;;  %v1524_v25 = vsub.f32 %v3452_v47, %v3864_v26 }
 0x349   : > { %v1702_v29 = vadd.f32 %v4088_v12, %v1701_v19  ;;  %2550 = vpow2.f32 %v1673_v27  ;;  %v1619_v62 = vmul.f32 1.442695, %v1520_v40  ;;  %v1526_v23 = vsub.f32 %v3492_v52, %v3864_v26  ;;  %v4717_v27 = vld [vmem:[#allocation18_spill] sm:$0xff] }
 0x34a   : > { %v1724_v34 = vadd.f32 %v4103_v41, %v1723_v14  ;;  %v4111_v0 = vpop.eup %2540  ;;  %2552 = vpow2.f32 %v1611_v39  ;;  %v1623_v4 = vmul.f32 1.442695, %v1522_v58  ;;  %v1528_v19 = vsub.f32 %v4717_v27, %v3864_v26 }
 0x34b   : > { %v1703_v8 = vadd.f32 %v4099_v44, %v1702_v29  ;;  %v4115_v51 = vpop.eup %2542  ;;  %2554 = vpow2.f32 %v1615_v6  ;;  %v1627_v32 = vmul.f32 1.442695, %v1524_v25  ;;  %v1631_v29 = vmul.f32 1.442695, %v1526_v23 }
 0x34c   : > { %v1725_v17 = vadd.f32 %v4111_v0, %v1724_v34  ;;  %v4119_v35 = vpop.eup %2544  ;;  %2556 = vpow2.f32 %v1619_v62  ;;  %v1530_v58 = vsub.f32 %v3556_v53, %v3864_v26  ;;  %v1635_v34 = vmul.f32 1.442695, %v1528_v19  ;;  %v4722_v19 = vld [vmem:[#allocation77_spill] sm:$0xff] }
 0x34d   : > { %v1704_v37 = vadd.f32 %v4107_v20, %v1703_v8  ;;  %v4123_v45 = vpop.eup %2546  ;;  %2558 = vpow2.f32 %v1623_v4  ;;  %v1532_v62 = vsub.f32 %v3580_v22, %v3864_v26  ;;  %v4720_v4 = vld [vmem:[#allocation35_spill] sm:$0xff] }
 0x34e   : > { %v1726_v47 = vadd.f32 %v4119_v35, %v1725_v17  ;;  %v4127_v42 = vpop.eup %2548  ;;  %2560 = vpow2.f32 %v1627_v32  ;;  %v1639_v53 = vmul.f32 1.442695, %v1530_v58  ;;  %v1536_v32 = vsub.f32 %v4722_v19, %v3864_v26 }
 0x34f   : > { %v1705_v33 = vadd.f32 %v4115_v51, %v1704_v37  ;;  %v4131_v50 = vpop.eup %2550  ;;  %2562 = vpow2.f32 %v1631_v29  ;;  %v1643_v22 = vmul.f32 1.442695, %v1532_v62  ;;  %v4723_v29 = vld [vmem:[#allocation79_spill] sm:$0xff] }
 0x350   : > { %v1727_v52 = vadd.f32 %v4127_v42, %v1726_v47  ;;  %v4135_v39 = vpop.eup %2552  ;;  %2564 = vpow2.f32 %v1635_v34  ;;  %v1651_v38 = vmul.f32 1.442695, %v1536_v32  ;;  %v4724_v34 = vld [vmem:[#allocation80_spill] sm:$0xff]  ;;  %v4726_v32 = vld [vmem:[#allocation42_spill] sm:$0xff] }
 0x351   : > { %v1706_v40 = vadd.f32 %v4123_v45, %v1705_v33  ;;  %v4141_v8 = vpop.eup %2554  ;;  %v1534_v33 = vsub.f32 %v4720_v4, %v3864_v26  ;;  %2566 = vpow2.f32 %v1639_v53  ;;  %v1540_v19 = vsub.f32 %v4724_v34, %v3864_v26 }
 0x352   : > { %v1728_v6 = vadd.f32 %v4135_v39, %v1727_v52  ;;  %4718 = vst [vmem:[#allocation29_spill] sm:$0xff] %v4141_v8  ;;  %v4146_v17 = vpop.eup %2556  ;;  %2568 = vpow2.f32 %v1643_v22 }
 0x353   : > { %v1707_v14 = vadd.f32 %v4131_v50, %v1706_v40  ;;  %4719 = vst [vmem:[#allocation78_spill] sm:$0xff] %v4146_v17  ;;  %v4151_v27 = vpop.eup %2558  ;;  %v1647_v58 = vmul.f32 1.442695, %v1534_v33  ;;  %v1659_v22 = vmul.f32 1.442695, %v1540_v19 }
 0x354   : > { %v1729_v37 = vadd.f32 %v4141_v8, %v1728_v6  ;;  %4721 = vst [vmem:[#allocation59_spill] sm:$0xff] %v4151_v27  ;;  %v4156_v6 = vpop.eup %2560  ;;  %v4725_v8 = vld [vmem:[#allocation36_spill] sm:$0xff] }
 0x355   : > { %v1708_v25 = vrot.slane %v1707_v14, 4  ;;  %v4161_v4 = vpop.eup %2562  ;;  %2570 = vpow2.f32 %v1647_v58 }
 0x356   : > { %v1730_v47 = vadd.f32 %v4146_v17, %v1729_v37  ;;  %2572 = vpow2.f32 %v1651_v38  ;;  %v4727_v17 = vld [vmem:[#allocation53_spill] sm:$0xff]  ;;  %v4728_v38 = vld [vmem:[#allocation22_spill] sm:$0xff] }
 0x357   : > { %v1709_v23 = vadd.f32 %v1708_v25, %v1707_v14  ;;  %v1538_v14 = vsub.f32 %v4723_v29, %v3864_v26  ;;  %v1542_v29 = vsub.f32 %v4725_v8, %v3864_v26  ;;  %v1546_v8 = vsub.f32 %v4727_v17, %v3864_v26 }
 0x358   : > { %v1731_v52 = vadd.f32 %v4151_v27, %v1730_v47  ;;  %v4166_v47 = vpop.eup %2564  ;;  %v1548_v58 = vsub.f32 %v4728_v38, %v3864_v26 }
 0x359   : > { %v1710_v40 = vrot.slane %v1709_v23, 2  ;;  %v1655_v33 = vmul.f32 1.442695, %v1538_v14  ;;  %v1671_v27 = vmul.f32 1.442695, %v1546_v8 }
 0x35a   : > { %v1732_v37 = vadd.f32 %v4156_v6, %v1731_v52  ;;  %v1544_v52 = vsub.f32 %v4726_v32, %v3864_v26 }
 0x35b   : > { %v1711_v25 = vadd.f32 %v1710_v40, %v1709_v23  ;;  %v4171_v40 = vpop.eup %2566 }
 0x35c   : > { %v1733_v62 = vadd.f32 %v4161_v4, %v1732_v37  ;;  %v4176_v34 = vpop.eup %2568 }
 0x35d   : > { %v1712_v43 = vrot.slane %v1711_v25, 1 }
 0x35e   : > { %v1734_v53 = vadd.f32 %v4166_v47, %v1733_v62  ;;  %v1667_v62 = vmul.f32 1.442695, %v1544_v52 }
 0x35f   : > { %v1713_v23 = vadd.f32 %v1712_v43, %v1711_v25  ;;  %v1663_v43 = vmul.f32 1.442695, %v1542_v29  ;;  %v4181_v25 = vpop.eup %2570 }
 0x360   : > { %v1735_v37 = vadd.f32 %v4171_v40, %v1734_v53  ;;  %v4185_v32 = vpop.eup %2572 }
 0x361   : > { %2574 = vrcp.f32 %v1713_v23  ;;  %v1762_v52 = vand.u32 2147483648, %v1713_v23  ;;  %vm1756_vm10 = vweird.f32 %v1713_v23 }
 0x362   : > { %2576 = vpow2.f32 %v1655_v33  ;;  %v1736_v14 = vadd.f32 %v4176_v34, %v1735_v37  ;;  %v1675_v33 = vmul.f32 1.442695, %v1548_v58 }
 0x363   : > { %2578 = vpow2.f32 %v1659_v22 }
 0x364   : > { %v1737_v19 = vadd.f32 %v4181_v25, %v1736_v14  ;;  %2580 = vpow2.f32 %v1663_v43  ;;  %v1760_v14 = vand.u32 2147483647, %v1713_v23 }
 0x365   : > { %2582 = vpow2.f32 %v1667_v62 }
 0x366   : > { %v1738_v17 = vadd.f32 %v4185_v32, %v1737_v19  ;;  %2584 = vpow2.f32 %v1671_v27  ;;  %vm1761_vm12 = vcmp.eq.f32.partialorder %v1760_v14, 8.507059e+37 }
 0x367   : > { %v2575_v53 = vpop.eup %2574  ;;  %2586 = vpow2.f32 %v1675_v33 }
 0x368   : > { %v1752_v31 = vmul.f32 %v2575_v53, %v1713_v23  ;;  %v4189_v29 = vpop.eup %2576  ;;  %vm1757_vm9 = vweird.f32 %v2575_v53 }
 0x369   : > { %v1739_v2 = vadd.f32 %v4189_v29, %v1738_v17  ;;  %v4192_v26 = vpop.eup %2578  ;;  %vm1758_vm11 = vmor %vm1756_vm10, %vm1757_vm9 }
 0x36a   : > { %v1753_v37 = vsub.f32 1.0, %v1752_v31  ;;  %v4195_v8 = vpop.eup %2580  ;;  %v1763_v31 = vor.u32 1.1754944e-38, %v1762_v52 }
 0x36b   : > { %v1740_v43 = vadd.f32 %v4192_v26, %v1739_v2  ;;  %v4198_v58 = vpop.eup %2582 }
 0x36c   : > { %v1754_v22 = vmul.f32 %v2575_v53, %v1753_v37  ;;  %v4201_v17 = vpop.eup %2584 }
 0x36d   : > { %v1741_v62 = vadd.f32 %v4195_v8, %v1740_v43 }
 0x36e   : > { %v1755_v38 = vadd.f32 %v2575_v53, %v1754_v22  ;;  %v4210_v22 = vpop.eup %2586 }
 0x36f   : > { %v1742_v27 = vadd.f32 %v4198_v58, %v1741_v62 }
 0x370   : > { %v1759_v19 = vsel %vm1758_vm11, %v2575_v53, %v1755_v38 }
 0x371   : > { %v4203_v37 = vsel %vm1761_vm12, %v1763_v31, %v1759_v19  ;;  %v1743_v2 = vadd.f32 %v4201_v17, %v1742_v27 }
 0x372   : > { %v1809_v33 = vmul.f32 %v3912_v57, %v4203_v37  ;;  %v1841_v23 = vmul.f32 %v4131_v50, %v4203_v37  ;;  %v1807_v53 = vmul.f32 %v3906_v60, %v4203_v37  ;;  %v1839_v14 = vmul.f32 %v4123_v45, %v4203_v37 }
 0x373   : > { %v1744_v52 = vadd.f32 %v4210_v22, %v1743_v2  ;;  %v1805_v57 = vmul.f32 %v3901_v3, %v4203_v37  ;;  %v1837_v50 = vmul.f32 %v4115_v51, %v4203_v37  ;;  %v1803_v62 = vmul.f32 %v3895_v56, %v4203_v37 }
 0x374   : > { %1923 = vmatpush.msra.mxu0 %v1809_v33  ;;  %1943 = vmatpush.msra.mxu1 %v1841_v23  ;;  %v1835_v60 = vmul.f32 %v4107_v20, %v4203_v37  ;;  %v1801_v45 = vmul.f32 %v3890_v18, %v4203_v37  ;;  %v1833_v3 = vmul.f32 %v4099_v44, %v4203_v37 }
 0x375   : > { %v1745_v43 = vrot.slane %v1744_v52, 4  ;;  %v1799_v51 = vmul.f32 %v3884_v11, %v4203_v37  ;;  %v1831_v56 = vmul.f32 %v4088_v12, %v4203_v37  ;;  %v1797_v20 = vmul.f32 %v3875_v48, %v4203_v37 }
 0x376   : > { %1924 = vmatpush.msra.mxu0 %v1807_v53  ;;  %1944 = vmatpush.msra.mxu1 %v1839_v14  ;;  %v1829_v18 = vmul.f32 %v4000_v7, %v4203_v37  ;;  %v1795_v44 = vmul.f32 %v3866_v49, %v4203_v37  ;;  %v1827_v11 = vmul.f32 %v3986_v63, %v4203_v37 }
 0x377   : > { %v1746_v38 = vadd.f32 %v1745_v43, %v1744_v52  ;;  %v1793_v12 = vmul.f32 %v3857_v59, %v4203_v37  ;;  %v1825_v48 = vmul.f32 %v3969_v21, %v4203_v37  ;;  %v1791_v7 = vmul.f32 %v3846_v55, %v4203_v37 }
 0x378   : > { %1925 = vmatpush.msra.mxu0 %v1805_v57  ;;  %1945 = vmatpush.msra.mxu1 %v1837_v50  ;;  %v1823_v49 = vmul.f32 %v3952_v30, %v4203_v37  ;;  %v1789_v63 = vmul.f32 %v3839_v9, %v4203_v37  ;;  %v1821_v33 = vmul.f32 %v3945_v16, %v4203_v37 }
 0x379   : > { %v1747_v31 = vrot.slane %v1746_v38, 2  ;;  %v1787_v21 = vmul.f32 %v3832_v61, %v4203_v37  ;;  %v1819_v55 = vmul.f32 %v3939_v10, %v4203_v37  ;;  %v1785_v30 = vmul.f32 %v3821_v13, %v4203_v37  ;;  %v4729_v61 = vld [vmem:[#allocation37_spill] sm:$0xff]  ;;  %v4730_v13 = vld [vmem:[#allocation32_spill] sm:$0xff] }
 0x37a   : > { %1926 = vmatpush.msra.mxu0 %v1803_v62  ;;  %1946 = vmatpush.msra.mxu1 %v1835_v60  ;;  %v1817_v9 = vmul.f32 %v3932_v24, %v4203_v37  ;;  %v1783_v43 = vmul.f32 %v4729_v61, %v4203_v37  ;;  %v1815_v10 = vmul.f32 %v3926_v46, %v4203_v37  ;;  %v4731_v24 = vld [vmem:[#allocation43_spill] sm:$0xff] }
 0x37b   : > { %v1748_v19 = vadd.f32 %v1747_v31, %v1746_v38  ;;  %v1781_v50 = vmul.f32 %v4730_v13, %v4203_v37  ;;  %v1813_v38 = vmul.f32 %v4731_v24, %v4203_v37  ;;  %v4732_v31 = vld [vmem:[#allocation20_spill] sm:$0xff]  ;;  %v4742_v13 = vld [vmem:[#allocation21_spill] sm:$0xff] }
 0x37c   : > { %1927 = vmatpush.msra.mxu0 %v1801_v45  ;;  %1947 = vmatpush.msra.mxu1 %v1833_v3  ;;  %v1765_v46 = vmul.f32 %v4732_v31, %v4203_v37  ;;  %v4733_v3 = vld [vmem:[#allocation45_spill] sm:$0xff] }
 0x37d   : > { %v1749_v27 = vrot.slane %v1748_v19, 1 }
 0x37e   : > { %1928 = vmatpush.msra.mxu0 %v1799_v51  ;;  %1948 = vmatpush.msra.mxu1 %v1831_v56 }
 0x37f   : > { %v1750_v2 = vadd.f32 %v1749_v27, %v1748_v19  ;;  %v1811_v19 = vmul.f32 %v4733_v3, %v4203_v37 }
 0x380   : > { %1929 = vmatpush.msra.mxu0 %v1797_v20  ;;  %1949 = vmatpush.msra.mxu1 %v1829_v18  ;;  %v4286_v18 = vld [vmem:[%s2861_s28] sm:$0xff] }
 0x381   : > { %2588 = vrcp.f32 %v1750_v2  ;;  %v1775_v16 = vand.u32 2147483647, %v1750_v2  ;;  %v1777_v53 = vand.u32 2147483648, %v1750_v2  ;;  %vm1771_vm14 = vweird.f32 %v1750_v2 }
 0x382   : > { %1930 = vmatpush.msra.mxu0 %v1795_v44  ;;  %1950 = vmatpush.msra.mxu1 %v1827_v11  ;;  %v4736_v11 = vld [vmem:[#allocation40_spill] sm:$0xff] }
 0x383   : > { %v1778_v62 = vor.u32 1.1754944e-38, %v1777_v53  ;;  %vm1776_vm0 = vcmp.eq.f32.partialorder %v1775_v16, 8.507059e+37 }
 0x384   : > { %1931 = vmatpush.msra.mxu0 %v1793_v12  ;;  %1951 = vmatpush.msra.mxu1 %v1825_v48  ;;  %v4737_v12 = vld [vmem:[#allocation59_spill] sm:$0xff] }
 0x386   : > { %1932 = vmatpush.msra.mxu0 %v1791_v7  ;;  %1952 = vmatpush.msra.mxu1 %v1823_v49  ;;  %v4739_v49 = vld [vmem:[#allocation78_spill] sm:$0xff] }
 0x387   : > { %v2589_v59 = vpop.eup %2588 }
 0x388   : > { %v1767_v23 = vmul.f32 %v2589_v59, %v1750_v2  ;;  %1933 = vmatpush.msra.mxu0 %v1789_v63  ;;  %1953 = vmatpush.msra.mxu1 %v1821_v33  ;;  %vm1772_vm13 = vweird.f32 %v2589_v59  ;;  %v4300_v2 = vld [vmem:[%s2861_s28 + $0x8] sm:$0xff]  ;;  %v4740_v33 = vld [vmem:[#allocation51_spill] sm:$0xff] }
 0x389   : > { %vm1773_vm15 = vmor %vm1771_vm14, %vm1772_vm13 }
 0x38a   : > { %v1768_v52 = vsub.f32 1.0, %v1767_v23  ;;  %1934 = vmatpush.msra.mxu0 %v1787_v21  ;;  %1954 = vmatpush.msra.mxu1 %v1819_v55  ;;  %v4741_v23 = vld [vmem:[#allocation29_spill] sm:$0xff] }
 0x38c   : > { %v1769_v14 = vmul.f32 %v2589_v59, %v1768_v52  ;;  %1935 = vmatpush.msra.mxu0 %v1785_v30  ;;  %1955 = vmatpush.msra.mxu1 %v1817_v9 }
 0x38e   : > { %v1770_v57 = vadd.f32 %v2589_v59, %v1769_v14  ;;  %1936 = vmatpush.msra.mxu0 %v1783_v43  ;;  %1956 = vmatpush.msra.mxu1 %v1815_v10 }
 0x390   : > { %v1774_v60 = vsel %vm1773_vm15, %v2589_v59, %v1770_v57  ;;  %1937 = vmatpush.msra.mxu0 %v1781_v50  ;;  %1957 = vmatpush.msra.mxu1 %v1813_v38 }
 0x391   : > { %v4271_v45 = vsel %vm1776_vm0, %v1778_v62, %v1774_v60  ;;  %v4743_v60 = vld [vmem:[#allocation25_spill] sm:$0xff] }
 0x392   : > { %v1810_v51 = vmul.f32 %v4135_v39, %v4271_v45  ;;  %v1842_v56 = vmul.f32 %v4210_v22, %v4271_v45  ;;  %1938 = vmatpush.msra.mxu0 %v1765_v46  ;;  %1958 = vmatpush.msra.mxu1 %v1811_v19  ;;  %v1808_v27 = vmul.f32 %v4127_v42, %v4271_v45 }
 0x393   : > { %v1840_v20 = vmul.f32 %v4201_v17, %v4271_v45  ;;  %v1806_v37 = vmul.f32 %v4119_v35, %v4271_v45  ;;  %1939 = vmatmul.f32.vlgmr.msra.gmra.mxu0 %v4286_v18  ;;  %v1838_v39 = vmul.f32 %v4198_v58, %v4271_v45  ;;  %v1828_v22 = vmul.f32 %v4181_v25, %v4271_v45 }
 0x394   : > { %1963 = vmatpush.msra.mxu2 %v1810_v51  ;;  %1983 = vmatpush.msra.mxu3 %v1842_v56  ;;  %v1826_v42 = vmul.f32 %v4176_v34, %v4271_v45  ;;  %v1824_v17 = vmul.f32 %v4171_v40, %v4271_v45  ;;  %v1822_v35 = vmul.f32 %v4166_v47, %v4271_v45 }
 0x395   : > { %1959 = vmatmul.f32.vlgmr.msra.gmra.mxu1 %v4300_v2  ;;  %v1804_v58 = vmul.f32 %v4111_v0, %v4271_v45  ;;  %v1836_v25 = vmul.f32 %v4195_v8, %v4271_v45  ;;  %v1820_v34 = vmul.f32 %v4161_v4, %v4271_v45  ;;  %v1818_v40 = vmul.f32 %v4156_v6, %v4271_v45 }
 0x396   : > { %1964 = vmatpush.msra.mxu2 %v1808_v27  ;;  %1984 = vmatpush.msra.mxu3 %v1840_v20  ;;  %v1802_v47 = vmul.f32 %v4103_v41, %v4271_v45  ;;  %v1834_v44 = vmul.f32 %v4192_v26, %v4271_v45  ;;  %v1800_v0 = vmul.f32 %v4095_v28, %v4271_v45  ;;  %v4735_v26 = vld [vmem:[#allocation54_spill] sm:$0xff] }
 0x397   : > { %v1832_v8 = vmul.f32 %v4189_v29, %v4271_v45  ;;  %v1798_v6 = vmul.f32 %v4083_v36, %v4271_v45  ;;  %v1830_v4 = vmul.f32 %v4185_v32, %v4271_v45  ;;  %v1796_v41 = vmul.f32 %v4061_v15, %v4271_v45  ;;  %v4734_v32 = vld [vmem:[#allocation19_spill] sm:$0xff] }
 0x398   : > { %1965 = vmatpush.msra.mxu2 %v1806_v37  ;;  %1985 = vmatpush.msra.mxu3 %v1838_v39  ;;  %v1794_v28 = vmul.f32 %v4046_v5, %v4271_v45  ;;  %v1792_v29 = vmul.f32 %v4033_v54, %v4271_v45  ;;  %v1790_v36 = vmul.f32 %v4018_v1, %v4271_v45  ;;  %v4738_v1 = vld [vmem:[#allocation48_spill] sm:$0xff] }
 0x399   : > { %v1788_v15 = vmul.f32 %v4734_v32, %v4271_v45  ;;  %v1786_v5 = vmul.f32 %v4735_v26, %v4271_v45  ;;  %v1784_v54 = vmul.f32 %v4736_v11, %v4271_v45  ;;  %v1816_v48 = vmul.f32 %v4737_v12, %v4271_v45 }
 0x39a   : > { %1966 = vmatpush.msra.mxu2 %v1804_v58  ;;  %1986 = vmatpush.msra.mxu3 %v1836_v25  ;;  %v1782_v7 = vmul.f32 %v4738_v1, %v4271_v45  ;;  %v1814_v63 = vmul.f32 %v4739_v49, %v4271_v45  ;;  %v1780_v59 = vmul.f32 %v4740_v33, %v4271_v45 }
 0x39b   : > { %v1812_v21 = vmul.f32 %v4741_v23, %v4271_v45 }
 0x39c   : > { %1967 = vmatpush.msra.mxu2 %v1802_v47  ;;  %1987 = vmatpush.msra.mxu3 %v1834_v44 }
 0x39e   : > { %1968 = vmatpush.msra.mxu2 %v1800_v0  ;;  %1988 = vmatpush.msra.mxu3 %v1832_v8 }
 0x3a0   : > { %1969 = vmatpush.msra.mxu2 %v1798_v6  ;;  %1989 = vmatpush.msra.mxu3 %v1830_v4 }
 0x3a2   : > { %1970 = vmatpush.msra.mxu2 %v1796_v41  ;;  %1990 = vmatpush.msra.mxu3 %v1828_v22 }
 0x3a4   : > { %1971 = vmatpush.msra.mxu2 %v1794_v28  ;;  %1991 = vmatpush.msra.mxu3 %v1826_v42 }
 0x3a6   : > { %1972 = vmatpush.msra.mxu2 %v1792_v29  ;;  %1992 = vmatpush.msra.mxu3 %v1824_v17 }
 0x3a8   : > { %1973 = vmatpush.msra.mxu2 %v1790_v36  ;;  %1993 = vmatpush.msra.mxu3 %v1822_v35 }
 0x3aa   : > { %1974 = vmatpush.msra.mxu2 %v1788_v15  ;;  %1994 = vmatpush.msra.mxu3 %v1820_v34 }
 0x3ac   : > { %1975 = vmatpush.msra.mxu2 %v1786_v5  ;;  %1995 = vmatpush.msra.mxu3 %v1818_v40 }
 0x3ae   : > { %1976 = vmatpush.msra.mxu2 %v1784_v54  ;;  %1996 = vmatpush.msra.mxu3 %v1816_v48 }
 0x3b0   : > { %1977 = vmatpush.msra.mxu2 %v1782_v7  ;;  %1997 = vmatpush.msra.mxu3 %v1814_v63 }
 0x3b2   : > { %1978 = vmatpush.msra.mxu2 %v1780_v59  ;;  %1998 = vmatpush.msra.mxu3 %v1812_v21 }
 0x3b3   : > { %1979 = vmatmul.f32.vlgmr.msra.gmra.mxu2 %v4286_v18  ;;  %1999 = vmatmul.f32.vlgmr.msra.gmra.mxu3 %v4300_v2 }
 0x3c2   : > { %v1860_v55 = vpop.f32.mrf.mxu0 }
 0x3c3   : > { %v1880_v52 = vpop.f32.mrf.mxu1 }
 0x3c4   : > { %v1881_v30 = vadd.f32 %v1880_v52, %v1860_v55 }
 0x3c6   : > { %v2003_v9 = vadd.f32 %v4286_v18, %v1881_v30 }
 0x3c7   : > { %v1900_v16 = vpop.f32.mrf.mxu2 }
 0x3c8   : > { %2005 = vst [vmem:[%s201_s30] sm:$0xff] %v2003_v9  ;;  %v1920_v53 = vpop.f32.mrf.mxu3 }
 0x3c9   : > { %v1921_v14 = vadd.f32 %v1920_v53, %v1900_v16 }
 0x3cb   : > { %v2004_v61 = vadd.f32 %v4300_v2, %v1921_v14 }
 0x3cd   : > { %2006 = vst [vmem:[%s201_s30 + $0x8] sm:$0xff] %v2004_v61 }
 0x410   : > { %v1940_v43 = vpop.f32.mrf.mxu0 }
 0x412   : > { %v1960_v10 = vpop.f32.mrf.mxu1 }
 0x413   : > { %v1961_v57 = vadd.f32 %v1960_v10, %v1940_v43 }
 0x415   : > { %v2007_v50 = vadd.f32 %v4742_v13, %v1961_v57 }
 0x417   : > { %2009 = vst [vmem:[%s201_s30 + $0x10] sm:$0xff] %v2007_v50 }
 0x436   : > { %v1980_v24 = vpop.f32.mrf.mxu2  ;;  %v2000_v38 = vpop.f32.mrf.mxu3 }
 0x437   : > { %v2001_v62 = vadd.f32 %v2000_v38, %v1980_v24 }
 0x439   : > { %v2008_v31 = vadd.f32 %v4743_v60, %v2001_v62 }
 0x43b   : > { %2010 = vst [vmem:[%s201_s30 + $0x18] sm:$0xff] %v2008_v31 }
 0x43c   : > { %2681 = shalt.err (!%p2678_p0)
}
 0x43d   : > { %s2726_s23 = smov 256   ;;  %s2727_s28 = smov 16  }
 0x43e   : > { %2276 = dma.vmem_to_hbm [thread:$0]  (%p2793_p11), %s2025_s16, 512, %s2027_s17, %s2012_s29, %s2726_s23, %s2726_s23, %s2727_s28  }
 0x43f PF: > { %s2041_s4 = sand.u32 1, %s2712_s9   ;;  %p4744_p1 = scmp.ge.s32.totalorder %s2724_s12, 2 }
 0x440   : > { %s2042_s26 = scalar_lea.sflag [#allocation4], %s2041_s4 }
 0x441   : > { %p2286_p4 = pnand %p4744_p1, %p2797_p12 }
 0x443   : > { %p2287_p7 = pneg %p2286_p4 }
 0x445   : > { %2707 = dma.done.wait (%p2287_p7), %s2042_s26, 512  }
 0x446   : > { %2709 = vsyncadd (%p2287_p7), %s2042_s26, 4294966784  ;;  %p18_p5 = scmp.ge.s32.totalorder %s2768_s15, 4   ;;  %s4745_s9 = smov %s2716_s10 }
 0x447   : > { %s4746_s10 = smov %s2720_s11  ;;  %s4747_s11 = smov %s2780_s18 }
 0x448   : > { %s4748_s12 = smov %s2768_s15  ;;  %20 = sbr.rel (!%p18_p5) target bundleno = 7 (0x7), region = 86 }
 0x44d   :  { %2048 = vsyncpa [#allocation3], 1 }
 0x44e   :  { %2050 = vsyncpa [#allocation3 + $0x1], 1 }
 0x44f   :  { %2051 = vsyncpa [#allocation6], 1 }
 0x450   :  { %2053 = vsyncpa [#allocation6 + $0x1], 1 }
 0x451   :  { %2054 = vsyncpa [#allocation4], 1 }
 0x452   :  { %2056 = vsyncpa [#allocation4 + $0x1], 1 }

</bundles_post_ra>
